<compile_context>
chip_gen: v7x
topology: tpu7x:2x2x1
jax: 0.10.0
libtpu: 0.0.40
codegen_flags: <defaults>
</compile_context>

<pallas_src>
import functools

import jax
import jax.numpy as jnp
from jax import lax
from jax.experimental import pallas as pl
from jax.experimental.pallas import tpu as pltpu

# ----------------------------- config (opts) ---------------------------------
NDF = 8             # opts.NDF  (small for the demo)
CONDITIONAL = True  # opts.CONDITIONAL
EMBED_SIZE = 16
BN_EPS = 1e-5
LRELU_SLOPE = 0.2


# ------------------------------ Pallas kernel ---------------------------------
def _conv_fused_kernel(*refs, fuse_bn: bool):
    """Transposed conv-GEMM with fused (optional) BatchNorm + LeakyReLU.

    wt_ref: [C_out, K]  bf16   (reordered conv weight)
    pt_ref: [K, M]      bf16   (im2col patches, transposed; M = N*OH*OW)
    g_ref/b_ref: [C_out, 1] f32 (BatchNorm gamma/beta; only if fuse_bn)
    o_ref:  [C_out, M]  bf16
    """
    if fuse_bn:
        wt_ref, pt_ref, g_ref, b_ref, o_ref = refs
    else:
        wt_ref, pt_ref, o_ref = refs
        g_ref = b_ref = None

    # MXU: bf16 operands, f32 accumulator.  Output is lane-dense ([C_out, M]).
    acc = jnp.dot(wt_ref[...], pt_ref[...], preferred_element_type=jnp.float32)

    if fuse_bn:
        # Training-mode BatchNorm over the batch*spatial axis (lane axis),
        # biased variance — matches torch's normalization.  All in f32.
        mean = jnp.mean(acc, axis=1, keepdims=True)
        var = jnp.mean(jnp.square(acc - mean), axis=1, keepdims=True)
        scale = g_ref[...] * lax.rsqrt(var + BN_EPS)
        shift = b_ref[...] - mean * scale
        acc = acc * scale + shift

    # LeakyReLU(0.2), f32 vreg math.
    acc = jnp.where(acc > 0, acc, LRELU_SLOPE * acc)
    o_ref[...] = acc.astype(o_ref.dtype)


def conv_bn_lrelu_T(wt_bf16, pt_bf16, gamma=None, beta=None):
    """y^T = LeakyReLU(BN(W^T @ P^T)) as a single Pallas call.  Returns [C_out, M] bf16."""
    C_out, K = wt_bf16.shape
    K2, M = pt_bf16.shape
    assert K == K2
    fuse_bn = gamma is not None

    in_specs = [
        pl.BlockSpec((C_out, K), lambda i: (0, 0)),
        pl.BlockSpec((K, M), lambda i: (0, 0)),
    ]
    args = [wt_bf16, pt_bf16]
    if fuse_bn:
        in_specs += [
            pl.BlockSpec((C_out, 1), lambda i: (0, 0)),
            pl.BlockSpec((C_out, 1), lambda i: (0, 0)),
        ]
        args += [
            gamma.reshape(C_out, 1).astype(jnp.float32),
            beta.reshape(C_out, 1).astype(jnp.float32),
        ]

    return pl.pallas_call(
        functools.partial(_conv_fused_kernel, fuse_bn=fuse_bn),
        out_shape=jax.ShapeDtypeStruct((C_out, M), jnp.bfloat16),
        grid=(1,),  # whole layer fits comfortably in VMEM at these shapes
        in_specs=in_specs,
        out_specs=pl.BlockSpec((C_out, M), lambda i: (0, 0)),
        compiler_params=pltpu.CompilerParams(
            dimension_semantics=("arbitrary",),
            vmem_limit_bytes=32 * 1024 * 1024,
        ),
    )(*args)


# ------------------------- glue: transposed im2col ----------------------------
def _im2col_T(x_nhwc, kh=4, kw=4, stride=2, pad=1):
    """Return patches^T of shape [K, M] with K ordered (kh, kw, c_in) and
    M ordered (n, oh, ow).  Kept in XLA (fused slicing), tiny arrays."""
    N, H, W, C = x_nhwc.shape
    xp = jnp.pad(x_nhwc, ((0, 0), (pad, pad), (pad, pad), (0, 0)))
    OH = (H + 2 * pad - kh) // stride + 1
    OW = (W + 2 * pad - kw) // stride + 1
    cols = []
    for i in range(kh):
        for j in range(kw):
            cols.append(xp[:, i:i + stride * OH:stride, j:j + stride * OW:stride, :])
    patches = jnp.stack(cols, axis=0)                       # [KH*KW, N, OH, OW, C]
    pt = jnp.transpose(patches, (0, 4, 1, 2, 3)).reshape(kh * kw * C, N * OH * OW)
    return pt, OH, OW


def _reorder_weight(w_oihw):
    """torch [C_out, C_in, KH, KW] -> [C_out, KH*KW*C_in] matching _im2col_T's K order."""
    C_out, C_in, KH, KW = w_oihw.shape
    return jnp.transpose(w_oihw, (0, 2, 3, 1)).reshape(C_out, KH * KW * C_in)


# ------------------------------ params ----------------------------------------
def init_params(key, embed_size):
    ks = jax.random.split(key, 5)
    w1 = 0.02 * jax.random.normal(ks[0], (NDF, 3, 4, 4), jnp.float32)
    w2 = 0.02 * jax.random.normal(ks[1], (NDF * 2, NDF, 4, 4), jnp.float32)
    w3 = 0.02 * jax.random.normal(ks[2], (NDF * 4, NDF * 2, 4, 4), jnp.float32)
    w4 = 0.02 * jax.random.normal(ks[3], (NDF * 8, NDF * 4, 4, 4), jnp.float32)
    lin_in = 4 * 4 * NDF * 8 + (embed_size if CONDITIONAL else 0)
    w_lin = 0.02 * jax.random.normal(ks[4], (1, lin_in), jnp.float32)  # torch Linear layout
    p = {
        # conv weights reordered + pre-transposed for the [C_out, K] GEMM, bf16 MXU operands
        "w1t": _reorder_weight(w1).astype(jnp.bfloat16),
        "w2t": _reorder_weight(w2).astype(jnp.bfloat16),
        "w3t": _reorder_weight(w3).astype(jnp.bfloat16),
        "w4t": _reorder_weight(w4).astype(jnp.bfloat16),
        # BatchNorm affine params (freshly-constructed module values)
        "g2": jnp.ones((NDF * 2,), jnp.float32), "b2": jnp.zeros((NDF * 2,), jnp.float32),
        "g3": jnp.ones((NDF * 4,), jnp.float32), "b3": jnp.zeros((NDF * 4,), jnp.float32),
        "g4": jnp.ones((NDF * 8,), jnp.float32), "b4": jnp.zeros((NDF * 8,), jnp.float32),
        # Linear weight pre-transposed once at init ([lin_in, 1])
        "w_lin_t": jnp.transpose(w_lin, (1, 0)),
    }
    return p


# ------------------------------ forward ----------------------------------------
def discriminator_forward(params, x_nchw, emb):
    N = x_nchw.shape[0]
    # NCHW -> NHWC, bf16 HBM-resident activations (MXU-native, half the DMA bytes)
    x = jnp.transpose(x_nchw, (0, 2, 3, 1)).astype(jnp.bfloat16)

    # layer 1: conv + LeakyReLU (no BN), fused in one Pallas call
    pt, OH, OW = _im2col_T(x)
    yT = conv_bn_lrelu_T(params["w1t"], pt)                      # [NDF, N*OH*OW]
    x = jnp.transpose(yT.reshape(NDF, N, OH, OW), (1, 2, 3, 0))  # NHWC bf16

    # layers 2-4: conv + BatchNorm(batch stats) + LeakyReLU, one fused Pallas call each
    layers = (("w2t", "g2", "b2"), ("w3t", "g3", "b3"), ("w4t", "g4", "b4"))
    for li, (wk, gk, bk) in enumerate(layers):
        pt, OH, OW = _im2col_T(x)
        yT = conv_bn_lrelu_T(params[wk], pt, params[gk], params[bk])  # [C_out, M]
        C = params[wk].shape[0]
        if li < len(layers) - 1:
            x = jnp.transpose(yT.reshape(C, N, OH, OW), (1, 2, 3, 0))

    # flatten in NCHW order to match torch's .view(-1, 4*4*NDF*8)
    C4 = params["w4t"].shape[0]
    z = jnp.transpose(yT.reshape(C4, N, OH, OW), (1, 0, 2, 3)).reshape(N, -1)
    z = z.astype(jnp.float32)

    if CONDITIONAL:
        z = jnp.concatenate([z, emb.astype(jnp.float32)], axis=-1)

    # tiny [N, lin_in] x [lin_in, 1] linear + sigmoid: plain JAX (a 1-lane Pallas
    # output would be pure launch overhead and a fully-masked store).
    logits = jnp.dot(z, params["w_lin_t"], preferred_element_type=jnp.float32)
    return jax.nn.sigmoid(logits)


# ------------------------------ demo --------------------------------------------
if __name__ == "__main__":
    key = jax.random.PRNGKey(0)
    k_param, k_x, k_emb = jax.random.split(key, 3)

    params = init_params(k_param, EMBED_SIZE)

    # input must be 64x64 so the flatten is 4*4*NDF*8 (64 -> 32 -> 16 -> 8 -> 4)
    batch = 2
    x = jax.random.normal(k_x, (batch, 3, 64, 64), jnp.float32)   # NCHW, like PyTorch
    emb = jax.random.normal(k_emb, (batch, EMBED_SIZE), jnp.float32)

    fwd = jax.jit(discriminator_forward)
    out = fwd(params, x, emb)
    out = jax.block_until_ready(out)

    assert out.shape == (batch, 1)
    assert bool(jnp.all(jnp.isfinite(out)))
    assert bool(jnp.all((out >= 0.0) & (out <= 1.0)))
    print("KERNEL_OK")
</pallas_src>

<mosaic_0001>
module attributes {stable_mosaic.version = 11 : i64} {
  func.func @_conv_fused_kernel(%arg0: i32, %arg1: memref<8x48xbf16, #tpu.memory_space<vmem>>, %arg2: memref<48x2048xbf16, #tpu.memory_space<vmem>>, %arg3: memref<8x2048xbf16, #tpu.memory_space<vmem>>) attributes {dimension_semantics = [#tpu.dimension_semantics<arbitrary>], iteration_bounds = array<i64: 1>, scalar_prefetch = 0 : i64, scratch_operands = 0 : i64, tpu.core_type = #tpu.core_type<tc>, window_params = [{pipeline_mode = #tpu.pipeline_mode<synchronous>, transform_indices = @transform_0, window_bounds = array<i64: 8, 48>}, {pipeline_mode = #tpu.pipeline_mode<synchronous>, transform_indices = @transform_1, window_bounds = array<i64: 48, 2048>}, {pipeline_mode = #tpu.pipeline_mode<synchronous>, transform_indices = @transform_2, window_bounds = array<i64: 8, 2048>}]} {
    %c0 = arith.constant 0 : index
    %c0_0 = arith.constant 0 : index
    %0 = vector.load %arg1[%c0, %c0_0] : memref<8x48xbf16, #tpu.memory_space<vmem>>, vector<8x48xbf16>
    %c0_1 = arith.constant 0 : index
    %c0_2 = arith.constant 0 : index
    %1 = vector.load %arg2[%c0_1, %c0_2] : memref<48x2048xbf16, #tpu.memory_space<vmem>>, vector<48x2048xbf16>
    %cst = arith.constant dense<0.000000e+00> : vector<8x2048xf32>
    %2 = tpu.matmul %0, %1, %cst {dimension_numbers = #tpu.dot_dimension_numbers<[1], [0], [0], [1], [0, 0, 1, 1], [], []>} : vector<8x48xbf16>, vector<48x2048xbf16>, vector<8x2048xf32> -> vector<8x2048xf32>
    %cst_3 = arith.constant 0.000000e+00 : f32
    %3 = vector.broadcast %cst_3 : f32 to vector<8x2048xf32>
    %4 = arith.cmpf ogt, %2, %3 : vector<8x2048xf32>
    %cst_4 = arith.constant 2.000000e-01 : f32
    %5 = vector.broadcast %cst_4 : f32 to vector<8x2048xf32>
    %6 = arith.mulf %5, %2 : vector<8x2048xf32>
    %7 = arith.select %4, %2, %6 : vector<8x2048xi1>, vector<8x2048xf32>
    %8 = arith.truncf %7 : vector<8x2048xf32> to vector<8x2048xbf16>
    %c0_5 = arith.constant 0 : index
    %c0_6 = arith.constant 0 : index
    %9 = vector.load %arg3[%c0_5, %c0_6] : memref<8x2048xbf16, #tpu.memory_space<vmem>>, vector<8x2048xbf16>
    tpu.vector_store %arg3[%c0_5, %c0_6], %8 {strides = array<i32>} : memref<8x2048xbf16, #tpu.memory_space<vmem>>, vector<8x2048xbf16>,
    return
  }
  func.func @transform_0(%arg0: i32) -> (i32, i32) {
    %c0_i32 = arith.constant 0 : i32
    %c0_i32_0 = arith.constant 0 : i32
    %c0_i32_1 = arith.constant 0 : i32
    return %c0_i32, %c0_i32_0 : i32, i32
  }
  func.func @transform_1(%arg0: i32) -> (i32, i32) {
    %c0_i32 = arith.constant 0 : i32
    %c0_i32_0 = arith.constant 0 : i32
    %c0_i32_1 = arith.constant 0 : i32
    return %c0_i32, %c0_i32_0 : i32, i32
  }
  func.func @transform_2(%arg0: i32) -> (i32, i32) {
    %c0_i32 = arith.constant 0 : i32
    %c0_i32_0 = arith.constant 0 : i32
    %c0_i32_1 = arith.constant 0 : i32
    return %c0_i32, %c0_i32_0 : i32, i32
  }
}

module attributes {stable_mosaic.version = 11 : i64} {
  func.func @_conv_fused_kernel(%arg0: i32, %arg1: memref<16x128xbf16, #tpu.memory_space<vmem>>, %arg2: memref<128x512xbf16, #tpu.memory_space<vmem>>, %arg3: memref<16x1xf32, #tpu.memory_space<vmem>>, %arg4: memref<16x1xf32, #tpu.memory_space<vmem>>, %arg5: memref<16x512xbf16, #tpu.memory_space<vmem>>) attributes {dimension_semantics = [#tpu.dimension_semantics<arbitrary>], iteration_bounds = array<i64: 1>, scalar_prefetch = 0 : i64, scratch_operands = 0 : i64, tpu.core_type = #tpu.core_type<tc>, window_params = [{pipeline_mode = #tpu.pipeline_mode<synchronous>, transform_indices = @transform_0, window_bounds = array<i64: 16, 128>}, {pipeline_mode = #tpu.pipeline_mode<synchronous>, transform_indices = @transform_1, window_bounds = array<i64: 128, 512>}, {pipeline_mode = #tpu.pipeline_mode<synchronous>, transform_indices = @transform_2, window_bounds = array<i64: 16, 1>}, {pipeline_mode = #tpu.pipeline_mode<synchronous>, transform_indices = @transform_3, window_bounds = array<i64: 16, 1>}, {pipeline_mode = #tpu.pipeline_mode<synchronous>, transform_indices = @transform_4, window_bounds = array<i64: 16, 512>}]} {
    %c0 = arith.constant 0 : index
    %c0_0 = arith.constant 0 : index
    %0 = vector.load %arg1[%c0, %c0_0] : memref<16x128xbf16, #tpu.memory_space<vmem>>, vector<16x128xbf16>
    %c0_1 = arith.constant 0 : index
    %c0_2 = arith.constant 0 : index
    %1 = vector.load %arg2[%c0_1, %c0_2] : memref<128x512xbf16, #tpu.memory_space<vmem>>, vector<128x512xbf16>
    %cst = arith.constant dense<0.000000e+00> : vector<16x512xf32>
    %2 = tpu.matmul %0, %1, %cst {dimension_numbers = #tpu.dot_dimension_numbers<[1], [0], [0], [1], [0, 0, 1, 1], [], []>} : vector<16x128xbf16>, vector<128x512xbf16>, vector<16x512xf32> -> vector<16x512xf32>
    %cst_3 = arith.constant dense<0.000000e+00> : vector<16xf32>
    %3 = vector.multi_reduction <add>, %2, %cst_3 [1] : vector<16x512xf32> to vector<16xf32>
    %4 = vector.shape_cast %3 : vector<16xf32> to vector<16x1xf32>
    %cst_4 = arith.constant 5.120000e+02 : f32
    %5 = vector.broadcast %cst_4 : f32 to vector<16x1xf32>
    %6 = arith.divf %4, %5 : vector<16x1xf32>
    %7 = vector.broadcast %6 : vector<16x1xf32> to vector<16x512xf32>
    %8 = arith.subf %2, %7 : vector<16x512xf32>
    %9 = arith.mulf %8, %8 : vector<16x512xf32>
    %cst_5 = arith.constant dense<0.000000e+00> : vector<16xf32>
    %10 = vector.multi_reduction <add>, %9, %cst_5 [1] : vector<16x512xf32> to vector<16xf32>
    %11 = vector.shape_cast %10 : vector<16xf32> to vector<16x1xf32>
    %cst_6 = arith.constant 5.120000e+02 : f32
    %12 = vector.broadcast %cst_6 : f32 to vector<16x1xf32>
    %13 = arith.divf %11, %12 : vector<16x1xf32>
    %c0_7 = arith.constant 0 : index
    %c0_8 = arith.constant 0 : index
    %14 = vector.load %arg3[%c0_7, %c0_8] : memref<16x1xf32, #tpu.memory_space<vmem>>, vector<16x1xf32>
    %cst_9 = arith.constant 9.99999974E-6 : f32
    %15 = vector.broadcast %cst_9 : f32 to vector<16x1xf32>
    %16 = arith.addf %13, %15 : vector<16x1xf32>
    %17 = math.rsqrt %16 : vector<16x1xf32>
    %18 = arith.mulf %14, %17 : vector<16x1xf32>
    %c0_10 = arith.constant 0 : index
    %c0_11 = arith.constant 0 : index
    %19 = vector.load %arg4[%c0_10, %c0_11] : memref<16x1xf32, #tpu.memory_space<vmem>>, vector<16x1xf32>
    %20 = arith.mulf %6, %18 : vector<16x1xf32>
    %21 = arith.subf %19, %20 : vector<16x1xf32>
    %22 = vector.broadcast %18 : vector<16x1xf32> to vector<16x512xf32>
    %23 = arith.mulf %2, %22 : vector<16x512xf32>
    %24 = vector.broadcast %21 : vector<16x1xf32> to vector<16x512xf32>
    %25 = arith.addf %23, %24 : vector<16x512xf32>
    %cst_12 = arith.constant 0.000000e+00 : f32
    %26 = vector.broadcast %cst_12 : f32 to vector<16x512xf32>
    %27 = arith.cmpf ogt, %25, %26 : vector<16x512xf32>
    %cst_13 = arith.constant 2.000000e-01 : f32
    %28 = vector.broadcast %cst_13 : f32 to vector<16x512xf32>
    %29 = arith.mulf %28, %25 : vector<16x512xf32>
    %30 = arith.select %27, %25, %29 : vector<16x512xi1>, vector<16x512xf32>
    %31 = arith.truncf %30 : vector<16x512xf32> to vector<16x512xbf16>
    %c0_14 = arith.constant 0 : index
    %c0_15 = arith.constant 0 : index
    %32 = vector.load %arg5[%c0_14, %c0_15] : memref<16x512xbf16, #tpu.memory_space<vmem>>, vector<16x512xbf16>
    tpu.vector_store %arg5[%c0_14, %c0_15], %31 {strides = array<i32>} : memref<16x512xbf16, #tpu.memory_space<vmem>>, vector<16x512xbf16>,
    return
  }
  func.func @transform_0(%arg0: i32) -> (i32, i32) {
    %c0_i32 = arith.constant 0 : i32
    %c0_i32_0 = arith.constant 0 : i32
    %c0_i32_1 = arith.constant 0 : i32
    return %c0_i32, %c0_i32_0 : i32, i32
  }
  func.func @transform_1(%arg0: i32) -> (i32, i32) {
    %c0_i32 = arith.constant 0 : i32
    %c0_i32_0 = arith.constant 0 : i32
    %c0_i32_1 = arith.constant 0 : i32
    return %c0_i32, %c0_i32_0 : i32, i32
  }
  func.func @transform_2(%arg0: i32) -> (i32, i32) {
    %c0_i32 = arith.constant 0 : i32
    %c0_i32_0 = arith.constant 0 : i32
    %c0_i32_1 = arith.constant 0 : i32
    return %c0_i32, %c0_i32_0 : i32, i32
  }
  func.func @transform_3(%arg0: i32) -> (i32, i32) {
    %c0_i32 = arith.constant 0 : i32
    %c0_i32_0 = arith.constant 0 : i32
    %c0_i32_1 = arith.constant 0 : i32
    return %c0_i32, %c0_i32_0 : i32, i32
  }
  func.func @transform_4(%arg0: i32) -> (i32, i32) {
    %c0_i32 = arith.constant 0 : i32
    %c0_i32_0 = arith.constant 0 : i32
    %c0_i32_1 = arith.constant 0 : i32
    return %c0_i32, %c0_i32_0 : i32, i32
  }
}

module attributes {stable_mosaic.version = 11 : i64} {
  func.func @_conv_fused_kernel(%arg0: i32, %arg1: memref<32x256xbf16, #tpu.memory_space<vmem>>, %arg2: memref<256x128xbf16, #tpu.memory_space<vmem>>, %arg3: memref<32x1xf32, #tpu.memory_space<vmem>>, %arg4: memref<32x1xf32, #tpu.memory_space<vmem>>, %arg5: memref<32x128xbf16, #tpu.memory_space<vmem>>) attributes {dimension_semantics = [#tpu.dimension_semantics<arbitrary>], iteration_bounds = array<i64: 1>, scalar_prefetch = 0 : i64, scratch_operands = 0 : i64, tpu.core_type = #tpu.core_type<tc>, window_params = [{pipeline_mode = #tpu.pipeline_mode<synchronous>, transform_indices = @transform_0, window_bounds = array<i64: 32, 256>}, {pipeline_mode = #tpu.pipeline_mode<synchronous>, transform_indices = @transform_1, window_bounds = array<i64: 256, 128>}, {pipeline_mode = #tpu.pipeline_mode<synchronous>, transform_indices = @transform_2, window_bounds = array<i64: 32, 1>}, {pipeline_mode = #tpu.pipeline_mode<synchronous>, transform_indices = @transform_3, window_bounds = array<i64: 32, 1>}, {pipeline_mode = #tpu.pipeline_mode<synchronous>, transform_indices = @transform_4, window_bounds = array<i64: 32, 128>}]} {
    %c0 = arith.constant 0 : index
    %c0_0 = arith.constant 0 : index
    %0 = vector.load %arg1[%c0, %c0_0] : memref<32x256xbf16, #tpu.memory_space<vmem>>, vector<32x256xbf16>
    %c0_1 = arith.constant 0 : index
    %c0_2 = arith.constant 0 : index
    %1 = vector.load %arg2[%c0_1, %c0_2] : memref<256x128xbf16, #tpu.memory_space<vmem>>, vector<256x128xbf16>
    %cst = arith.constant dense<0.000000e+00> : vector<32x128xf32>
    %2 = tpu.matmul %0, %1, %cst {dimension_numbers = #tpu.dot_dimension_numbers<[1], [0], [0], [1], [0, 0, 1, 1], [], []>} : vector<32x256xbf16>, vector<256x128xbf16>, vector<32x128xf32> -> vector<32x128xf32>
    %cst_3 = arith.constant dense<0.000000e+00> : vector<32xf32>
    %3 = vector.multi_reduction <add>, %2, %cst_3 [1] : vector<32x128xf32> to vector<32xf32>
    %4 = vector.shape_cast %3 : vector<32xf32> to vector<32x1xf32>
    %cst_4 = arith.constant 1.280000e+02 : f32
    %5 = vector.broadcast %cst_4 : f32 to vector<32x1xf32>
    %6 = arith.divf %4, %5 : vector<32x1xf32>
    %7 = vector.broadcast %6 : vector<32x1xf32> to vector<32x128xf32>
    %8 = arith.subf %2, %7 : vector<32x128xf32>
    %9 = arith.mulf %8, %8 : vector<32x128xf32>
    %cst_5 = arith.constant dense<0.000000e+00> : vector<32xf32>
    %10 = vector.multi_reduction <add>, %9, %cst_5 [1] : vector<32x128xf32> to vector<32xf32>
    %11 = vector.shape_cast %10 : vector<32xf32> to vector<32x1xf32>
    %cst_6 = arith.constant 1.280000e+02 : f32
    %12 = vector.broadcast %cst_6 : f32 to vector<32x1xf32>
    %13 = arith.divf %11, %12 : vector<32x1xf32>
    %c0_7 = arith.constant 0 : index
    %c0_8 = arith.constant 0 : index
    %14 = vector.load %arg3[%c0_7, %c0_8] : memref<32x1xf32, #tpu.memory_space<vmem>>, vector<32x1xf32>
    %cst_9 = arith.constant 9.99999974E-6 : f32
    %15 = vector.broadcast %cst_9 : f32 to vector<32x1xf32>
    %16 = arith.addf %13, %15 : vector<32x1xf32>
    %17 = math.rsqrt %16 : vector<32x1xf32>
    %18 = arith.mulf %14, %17 : vector<32x1xf32>
    %c0_10 = arith.constant 0 : index
    %c0_11 = arith.constant 0 : index
    %19 = vector.load %arg4[%c0_10, %c0_11] : memref<32x1xf32, #tpu.memory_space<vmem>>, vector<32x1xf32>
    %20 = arith.mulf %6, %18 : vector<32x1xf32>
    %21 = arith.subf %19, %20 : vector<32x1xf32>
    %22 = vector.broadcast %18 : vector<32x1xf32> to vector<32x128xf32>
    %23 = arith.mulf %2, %22 : vector<32x128xf32>
    %24 = vector.broadcast %21 : vector<32x1xf32> to vector<32x128xf32>
    %25 = arith.addf %23, %24 : vector<32x128xf32>
    %cst_12 = arith.constant 0.000000e+00 : f32
    %26 = vector.broadcast %cst_12 : f32 to vector<32x128xf32>
    %27 = arith.cmpf ogt, %25, %26 : vector<32x128xf32>
    %cst_13 = arith.constant 2.000000e-01 : f32
    %28 = vector.broadcast %cst_13 : f32 to vector<32x128xf32>
    %29 = arith.mulf %28, %25 : vector<32x128xf32>
    %30 = arith.select %27, %25, %29 : vector<32x128xi1>, vector<32x128xf32>
    %31 = arith.truncf %30 : vector<32x128xf32> to vector<32x128xbf16>
    %c0_14 = arith.constant 0 : index
    %c0_15 = arith.constant 0 : index
    %32 = vector.load %arg5[%c0_14, %c0_15] : memref<32x128xbf16, #tpu.memory_space<vmem>>, vector<32x128xbf16>
    tpu.vector_store %arg5[%c0_14, %c0_15], %31 {strides = array<i32>} : memref<32x128xbf16, #tpu.memory_space<vmem>>, vector<32x128xbf16>,
    return
  }
  func.func @transform_0(%arg0: i32) -> (i32, i32) {
    %c0_i32 = arith.constant 0 : i32
    %c0_i32_0 = arith.constant 0 : i32
    %c0_i32_1 = arith.constant 0 : i32
    return %c0_i32, %c0_i32_0 : i32, i32
  }
  func.func @transform_1(%arg0: i32) -> (i32, i32) {
    %c0_i32 = arith.constant 0 : i32
    %c0_i32_0 = arith.constant 0 : i32
    %c0_i32_1 = arith.constant 0 : i32
    return %c0_i32, %c0_i32_0 : i32, i32
  }
  func.func @transform_2(%arg0: i32) -> (i32, i32) {
    %c0_i32 = arith.constant 0 : i32
    %c0_i32_0 = arith.constant 0 : i32
    %c0_i32_1 = arith.constant 0 : i32
    return %c0_i32, %c0_i32_0 : i32, i32
  }
  func.func @transform_3(%arg0: i32) -> (i32, i32) {
    %c0_i32 = arith.constant 0 : i32
    %c0_i32_0 = arith.constant 0 : i32
    %c0_i32_1 = arith.constant 0 : i32
    return %c0_i32, %c0_i32_0 : i32, i32
  }
  func.func @transform_4(%arg0: i32) -> (i32, i32) {
    %c0_i32 = arith.constant 0 : i32
    %c0_i32_0 = arith.constant 0 : i32
    %c0_i32_1 = arith.constant 0 : i32
    return %c0_i32, %c0_i32_0 : i32, i32
  }
}

module attributes {stable_mosaic.version = 11 : i64} {
  func.func @_conv_fused_kernel(%arg0: i32, %arg1: memref<64x512xbf16, #tpu.memory_space<vmem>>, %arg2: memref<512x32xbf16, #tpu.memory_space<vmem>>, %arg3: memref<64x1xf32, #tpu.memory_space<vmem>>, %arg4: memref<64x1xf32, #tpu.memory_space<vmem>>, %arg5: memref<64x32xbf16, #tpu.memory_space<vmem>>) attributes {dimension_semantics = [#tpu.dimension_semantics<arbitrary>], iteration_bounds = array<i64: 1>, scalar_prefetch = 0 : i64, scratch_operands = 0 : i64, tpu.core_type = #tpu.core_type<tc>, window_params = [{pipeline_mode = #tpu.pipeline_mode<synchronous>, transform_indices = @transform_0, window_bounds = array<i64: 64, 512>}, {pipeline_mode = #tpu.pipeline_mode<synchronous>, transform_indices = @transform_1, window_bounds = array<i64: 512, 32>}, {pipeline_mode = #tpu.pipeline_mode<synchronous>, transform_indices = @transform_2, window_bounds = array<i64: 64, 1>}, {pipeline_mode = #tpu.pipeline_mode<synchronous>, transform_indices = @transform_3, window_bounds = array<i64: 64, 1>}, {pipeline_mode = #tpu.pipeline_mode<synchronous>, transform_indices = @transform_4, window_bounds = array<i64: 64, 32>}]} {
    %c0 = arith.constant 0 : index
    %c0_0 = arith.constant 0 : index
    %0 = vector.load %arg1[%c0, %c0_0] : memref<64x512xbf16, #tpu.memory_space<vmem>>, vector<64x512xbf16>
    %c0_1 = arith.constant 0 : index
    %c0_2 = arith.constant 0 : index
    %1 = vector.load %arg2[%c0_1, %c0_2] : memref<512x32xbf16, #tpu.memory_space<vmem>>, vector<512x32xbf16>
    %cst = arith.constant dense<0.000000e+00> : vector<64x32xf32>
    %2 = tpu.matmul %0, %1, %cst {dimension_numbers = #tpu.dot_dimension_numbers<[1], [0], [0], [1], [0, 0, 1, 1], [], []>} : vector<64x512xbf16>, vector<512x32xbf16>, vector<64x32xf32> -> vector<64x32xf32>
    %cst_3 = arith.constant dense<0.000000e+00> : vector<64xf32>
    %3 = vector.multi_reduction <add>, %2, %cst_3 [1] : vector<64x32xf32> to vector<64xf32>
    %4 = vector.shape_cast %3 : vector<64xf32> to vector<64x1xf32>
    %cst_4 = arith.constant 3.200000e+01 : f32
    %5 = vector.broadcast %cst_4 : f32 to vector<64x1xf32>
    %6 = arith.divf %4, %5 : vector<64x1xf32>
    %7 = vector.broadcast %6 : vector<64x1xf32> to vector<64x32xf32>
    %8 = arith.subf %2, %7 : vector<64x32xf32>
    %9 = arith.mulf %8, %8 : vector<64x32xf32>
    %cst_5 = arith.constant dense<0.000000e+00> : vector<64xf32>
    %10 = vector.multi_reduction <add>, %9, %cst_5 [1] : vector<64x32xf32> to vector<64xf32>
    %11 = vector.shape_cast %10 : vector<64xf32> to vector<64x1xf32>
    %cst_6 = arith.constant 3.200000e+01 : f32
    %12 = vector.broadcast %cst_6 : f32 to vector<64x1xf32>
    %13 = arith.divf %11, %12 : vector<64x1xf32>
    %c0_7 = arith.constant 0 : index
    %c0_8 = arith.constant 0 : index
    %14 = vector.load %arg3[%c0_7, %c0_8] : memref<64x1xf32, #tpu.memory_space<vmem>>, vector<64x1xf32>
    %cst_9 = arith.constant 9.99999974E-6 : f32
    %15 = vector.broadcast %cst_9 : f32 to vector<64x1xf32>
    %16 = arith.addf %13, %15 : vector<64x1xf32>
    %17 = math.rsqrt %16 : vector<64x1xf32>
    %18 = arith.mulf %14, %17 : vector<64x1xf32>
    %c0_10 = arith.constant 0 : index
    %c0_11 = arith.constant 0 : index
    %19 = vector.load %arg4[%c0_10, %c0_11] : memref<64x1xf32, #tpu.memory_space<vmem>>, vector<64x1xf32>
    %20 = arith.mulf %6, %18 : vector<64x1xf32>
    %21 = arith.subf %19, %20 : vector<64x1xf32>
    %22 = vector.broadcast %18 : vector<64x1xf32> to vector<64x32xf32>
    %23 = arith.mulf %2, %22 : vector<64x32xf32>
    %24 = vector.broadcast %21 : vector<64x1xf32> to vector<64x32xf32>
    %25 = arith.addf %23, %24 : vector<64x32xf32>
    %cst_12 = arith.constant 0.000000e+00 : f32
    %26 = vector.broadcast %cst_12 : f32 to vector<64x32xf32>
    %27 = arith.cmpf ogt, %25, %26 : vector<64x32xf32>
    %cst_13 = arith.constant 2.000000e-01 : f32
    %28 = vector.broadcast %cst_13 : f32 to vector<64x32xf32>
    %29 = arith.mulf %28, %25 : vector<64x32xf32>
    %30 = arith.select %27, %25, %29 : vector<64x32xi1>, vector<64x32xf32>
    %31 = arith.truncf %30 : vector<64x32xf32> to vector<64x32xbf16>
    %c0_14 = arith.constant 0 : index
    %c0_15 = arith.constant 0 : index
    %32 = vector.load %arg5[%c0_14, %c0_15] : memref<64x32xbf16, #tpu.memory_space<vmem>>, vector<64x32xbf16>
    tpu.vector_store %arg5[%c0_14, %c0_15], %31 {strides = array<i32>} : memref<64x32xbf16, #tpu.memory_space<vmem>>, vector<64x32xbf16>,
    return
  }
  func.func @transform_0(%arg0: i32) -> (i32, i32) {
    %c0_i32 = arith.constant 0 : i32
    %c0_i32_0 = arith.constant 0 : i32
    %c0_i32_1 = arith.constant 0 : i32
    return %c0_i32, %c0_i32_0 : i32, i32
  }
  func.func @transform_1(%arg0: i32) -> (i32, i32) {
    %c0_i32 = arith.constant 0 : i32
    %c0_i32_0 = arith.constant 0 : i32
    %c0_i32_1 = arith.constant 0 : i32
    return %c0_i32, %c0_i32_0 : i32, i32
  }
  func.func @transform_2(%arg0: i32) -> (i32, i32) {
    %c0_i32 = arith.constant 0 : i32
    %c0_i32_0 = arith.constant 0 : i32
    %c0_i32_1 = arith.constant 0 : i32
    return %c0_i32, %c0_i32_0 : i32, i32
  }
  func.func @transform_3(%arg0: i32) -> (i32, i32) {
    %c0_i32 = arith.constant 0 : i32
    %c0_i32_0 = arith.constant 0 : i32
    %c0_i32_1 = arith.constant 0 : i32
    return %c0_i32, %c0_i32_0 : i32, i32
  }
  func.func @transform_4(%arg0: i32) -> (i32, i32) {
    %c0_i32 = arith.constant 0 : i32
    %c0_i32_0 = arith.constant 0 : i32
    %c0_i32_1 = arith.constant 0 : i32
    return %c0_i32, %c0_i32_0 : i32, i32
  }
}

</mosaic_0001>

<bundles_post_ra>
// kernel: discriminator_forward.4
= control target key start
LH: loop header
LB: loop body
LE: loop exit
PB: predicated region body
PF: predicated region fallthrough
CT: control target
= control target key end

     0   :  { %v830_v3 = vmov 0   ;;  %vm301_vm0 = vcmask 392192   ;;  %s1043_s1 = inlined_call_operand.vmem [shape: bf16[48,2048], index: 1, kind: input, shape index: {}]   ;;  %s1044_s0 = inlined_call_operand.vmem [shape: bf16[8,48], index: 0, kind: input, shape index: {}]   ;;  %s1045_s2 = inlined_call_operand.vmem [shape: bf16[8,2048], index: 2, kind: output, shape index: {}]  }
   0x1   :  { %v13_v0 = vld [vmem:[%s1043_s1] sm:$0xff]  ;;  %v14_v2 = vld [vmem:[%s1043_s1 + $0x8] sm:$0xff]  ;;  %337 = vmatprep.mubr.bf16.mxu0 %v830_v3  ;;  %378 = vmatprep.mubr.bf16.mxu1 %v830_v3  ;;  %v15_v23 = vld [vmem:[%s1043_s1 + $0x10] sm:$0xff] }
   0x2   :  { %v21_v1 = vld [vmem:[%s1043_s1 + $0x40] sm:$0xff]  ;;  %v22_v5 = vld [vmem:[%s1043_s1 + $0x48] sm:$0xff]  ;;  %v23_v24 = vld [vmem:[%s1043_s1 + $0x50] sm:$0xff] }
   0x3   :  { %v758_v4 = vcombine.high %v13_v0, %v21_v1  ;;  %v757_v6 = vcombine.low %v13_v0, %v21_v1  ;;  %v29_v7 = vld [vmem:[%s1043_s1 + $0x80] sm:$0xff]  ;;  %v760_v9 = vcombine.high %v14_v2, %v22_v5  ;;  %v759_v10 = vcombine.low %v14_v2, %v22_v5  ;;  %v30_v12 = vld [vmem:[%s1043_s1 + $0x88] sm:$0xff]  ;;  %v16_v25 = vld [vmem:[%s1043_s1 + $0x18] sm:$0xff] }
   0x4   :  { %v37_v8 = vld [vmem:[%s1043_s1 + $0xc0] sm:$0xff]  ;;  %v38_v13 = vld [vmem:[%s1043_s1 + $0xc8] sm:$0xff]  ;;  %v24_v26 = vld [vmem:[%s1043_s1 + $0x58] sm:$0xff]  ;;  %v762_v29 = vcombine.high %v15_v23, %v23_v24  ;;  %v761_v36 = vcombine.low %v15_v23, %v23_v24 }
   0x5   :  { %v774_v11 = vcombine.high %v29_v7, %v37_v8  ;;  %v45_v14 = vld [vmem:[%s1043_s1 + $0x100] sm:$0xff]  ;;  %305 = vmatprep.subr.bf16.mxu0 %v758_v4  ;;  %v776_v15 = vcombine.high %v30_v12, %v38_v13  ;;  %v46_v17 = vld [vmem:[%s1043_s1 + $0x108] sm:$0xff]  ;;  %346 = vmatprep.subr.bf16.mxu1 %v760_v9  ;;  %v773_v19 = vcombine.low %v29_v7, %v37_v8  ;;  %v31_v31 = vld [vmem:[%s1043_s1 + $0x90] sm:$0xff] }
   0x6   :  { %v53_v16 = vld [vmem:[%s1043_s1 + $0x140] sm:$0xff]  ;;  %v54_v18 = vld [vmem:[%s1043_s1 + $0x148] sm:$0xff]  ;;  %306 = vmatpush1.bf16.msra.mxu0 %v757_v6  ;;  %347 = vmatpush1.bf16.msra.mxu1 %v759_v10  ;;  %v775_v20 = vcombine.low %v30_v12, %v38_v13  ;;  %v764_v30 = vcombine.high %v16_v25, %v24_v26  ;;  %v39_v32 = vld [vmem:[%s1043_s1 + $0xd0] sm:$0xff]  ;;  %v763_v37 = vcombine.low %v16_v25, %v24_v26 }
   0x7   :  { %307 = vmatprep.subr.bf16.mxu0 %v774_v11  ;;  %v790_v21 = vcombine.high %v45_v14, %v53_v16  ;;  %348 = vmatprep.subr.bf16.mxu1 %v776_v15  ;;  %v792_v22 = vcombine.high %v46_v17, %v54_v18  ;;  %v789_v27 = vcombine.low %v45_v14, %v53_v16  ;;  %v32_v33 = vld [vmem:[%s1043_s1 + $0x98] sm:$0xff]  ;;  %v911_v35 = vld [vmem:[%s1044_s0] sm:$0xf]  ;;  %v47_v40 = vld [vmem:[%s1043_s1 + $0x110] sm:$0xff] }
   0x8   :  { %v791_v28 = vcombine.low %v46_v17, %v54_v18  ;;  %v40_v34 = vld [vmem:[%s1043_s1 + $0xd8] sm:$0xff]  ;;  %v778_v38 = vcombine.high %v31_v31, %v39_v32  ;;  %v55_v41 = vld [vmem:[%s1043_s1 + $0x150] sm:$0xff]  ;;  %v777_v44 = vcombine.low %v31_v31, %v39_v32  ;;  %v17_v48 = vld [vmem:[%s1043_s1 + $0x20] sm:$0xff] }
   0x9   :  { %v780_v39 = vcombine.high %v32_v33, %v40_v34  ;;  %v48_v42 = vld [vmem:[%s1043_s1 + $0x118] sm:$0xff]  ;;  %v779_v45 = vcombine.low %v32_v33, %v40_v34  ;;  %v794_v46 = vcombine.high %v47_v40, %v55_v41  ;;  %v25_v49 = vld [vmem:[%s1043_s1 + $0x60] sm:$0xff]  ;;  %v18_v50 = vld [vmem:[%s1043_s1 + $0x28] sm:$0xff]  ;;  %v793_v52 = vcombine.low %v47_v40, %v55_v41 }
   0xa   :  { %308 = vmatpush1.bf16.msra.mxu0 %v773_v19  ;;  %349 = vmatpush1.bf16.msra.mxu1 %v775_v20  ;;  %v56_v43 = vld [vmem:[%s1043_s1 + $0x158] sm:$0xff]  ;;  %v26_v51 = vld [vmem:[%s1043_s1 + $0x68] sm:$0xff]  ;;  %v766_v54 = vcombine.high %v17_v48, %v25_v49  ;;  %v33_v56 = vld [vmem:[%s1043_s1 + $0xa0] sm:$0xff]  ;;  %v765_v60 = vcombine.low %v17_v48, %v25_v49 }
   0xb   :  { %309 = vmatprep.subr.bf16.mxu0 %v790_v21  ;;  %350 = vmatprep.subr.bf16.mxu1 %v792_v22  ;;  %v796_v47 = vcombine.high %v48_v42, %v56_v43  ;;  %v795_v53 = vcombine.low %v48_v42, %v56_v43  ;;  %v768_v55 = vcombine.high %v18_v50, %v26_v51  ;;  %v41_v57 = vld [vmem:[%s1043_s1 + $0xe0] sm:$0xff]  ;;  %v34_v58 = vld [vmem:[%s1043_s1 + $0xa8] sm:$0xff]  ;;  %v19_v9 = vld [vmem:[%s1043_s1 + $0x30] sm:$0xff] }
   0xc   :  { %v42_v59 = vld [vmem:[%s1043_s1 + $0xe8] sm:$0xff]  ;;  %v767_v61 = vcombine.low %v18_v50, %v26_v51  ;;  %v782_v62 = vcombine.high %v33_v56, %v41_v57  ;;  %v49_v0 = vld [vmem:[%s1043_s1 + $0x120] sm:$0xff]  ;;  %v781_v5 = vcombine.low %v33_v56, %v41_v57  ;;  %v27_v10 = vld [vmem:[%s1043_s1 + $0x70] sm:$0xff] }
   0xd   :  { %v784_v63 = vcombine.high %v34_v58, %v42_v59  ;;  %v57_v1 = vld [vmem:[%s1043_s1 + $0x160] sm:$0xff]  ;;  %v50_v2 = vld [vmem:[%s1043_s1 + $0x128] sm:$0xff]  ;;  %v783_v6 = vcombine.low %v34_v58, %v42_v59  ;;  %v20_v11 = vld [vmem:[%s1043_s1 + $0x38] sm:$0xff]  ;;  %v770_v15 = vcombine.high %v19_v9, %v27_v10  ;;  %v769_v21 = vcombine.low %v19_v9, %v27_v10 }
   0xe   :  { %310 = vmatpush1.bf16.msra.mxu0 %v789_v27  ;;  %351 = vmatpush1.bf16.msra.mxu1 %v791_v28  ;;  %v58_v4 = vld [vmem:[%s1043_s1 + $0x168] sm:$0xff]  ;;  %v798_v7 = vcombine.high %v49_v0, %v57_v1  ;;  %v28_v12 = vld [vmem:[%s1043_s1 + $0x78] sm:$0xff]  ;;  %v797_v13 = vcombine.low %v49_v0, %v57_v1  ;;  %v35_v17 = vld [vmem:[%s1043_s1 + $0xb0] sm:$0xff] }
   0xf   :  { %387 = vmatprep.subr.bf16.mxu0 %v762_v29  ;;  %428 = vmatprep.subr.bf16.mxu1 %v764_v30  ;;  %v800_v8 = vcombine.high %v50_v2, %v58_v4  ;;  %v799_v14 = vcombine.low %v50_v2, %v58_v4  ;;  %v772_v16 = vcombine.high %v20_v11, %v28_v12  ;;  %v43_v18 = vld [vmem:[%s1043_s1 + $0xf0] sm:$0xff]  ;;  %v36_v19 = vld [vmem:[%s1043_s1 + $0xb8] sm:$0xff] }
  0x10   :  { %v44_v20 = vld [vmem:[%s1043_s1 + $0xf8] sm:$0xff]  ;;  %v771_v22 = vcombine.low %v20_v11, %v28_v12  ;;  %v786_v23 = vcombine.high %v35_v17, %v43_v18  ;;  %v51_v25 = vld [vmem:[%s1043_s1 + $0x130] sm:$0xff]  ;;  %v785_v29 = vcombine.low %v35_v17, %v43_v18 }
  0x11   :  { %805 = vmatmul.mubr.msk.bf16.vlgmr.msra.gmra.mrb[0].mxu0 %vm301_vm0, %v911_v35  ;;  %806 = vmatmul.mubr.msk.bf16.vlgmr.msra.gmra.mrb[0].mxu1 %vm301_vm0, %v911_v35  ;;  %v788_v24 = vcombine.high %v36_v19, %v44_v20  ;;  %v59_v26 = vld [vmem:[%s1043_s1 + $0x170] sm:$0xff]  ;;  %v52_v27 = vld [vmem:[%s1043_s1 + $0x138] sm:$0xff]  ;;  %v787_v30 = vcombine.low %v36_v19, %v44_v20 }
  0x12   :  { %388 = vmatpush1.bf16.msra.mxu0 %v761_v36  ;;  %429 = vmatpush1.bf16.msra.mxu1 %v763_v37  ;;  %v60_v28 = vld [vmem:[%s1043_s1 + $0x178] sm:$0xff]  ;;  %v802_v31 = vcombine.high %v51_v25, %v59_v26  ;;  %v801_v33 = vcombine.low %v51_v25, %v59_v26 }
  0x13   :  { %389 = vmatprep.subr.bf16.mxu0 %v778_v38  ;;  %430 = vmatprep.subr.bf16.mxu1 %v780_v39  ;;  %v804_v32 = vcombine.high %v52_v27, %v60_v28  ;;  %v803_v34 = vcombine.low %v52_v27, %v60_v28 }
  0x14   :  { %419 = vmatprep.mubr.bf16.mxu0 %v830_v3  ;;  %460 = vmatprep.mubr.bf16.mxu1 %v830_v3 }
  0x16   :  { %390 = vmatpush1.bf16.msra.mxu0 %v777_v44  ;;  %431 = vmatpush1.bf16.msra.mxu1 %v779_v45 }
  0x17   :  { %391 = vmatprep.subr.bf16.mxu0 %v794_v46  ;;  %432 = vmatprep.subr.bf16.mxu1 %v796_v47 }
  0x1a   :  { %392 = vmatpush1.bf16.msra.mxu0 %v793_v52  ;;  %433 = vmatpush1.bf16.msra.mxu1 %v795_v53 }
  0x1b   :  { %469 = vmatprep.subr.bf16.mxu0 %v766_v54  ;;  %510 = vmatprep.subr.bf16.mxu1 %v768_v55 }
  0x1d   :  { %807 = vmatmul.mubr.msk.bf16.vlgmr.msra.gmra.mrb[4].mxu0 %vm301_vm0, %v911_v35  ;;  %808 = vmatmul.mubr.msk.bf16.vlgmr.msra.gmra.mrb[4].mxu1 %vm301_vm0, %v911_v35 }
  0x1e   :  { %470 = vmatpush1.bf16.msra.mxu0 %v765_v60  ;;  %511 = vmatpush1.bf16.msra.mxu1 %v767_v61 }
  0x1f   :  { %471 = vmatprep.subr.bf16.mxu0 %v782_v62  ;;  %512 = vmatprep.subr.bf16.mxu1 %v784_v63 }
  0x20   :  { %501 = vmatprep.mubr.bf16.mxu0 %v830_v3  ;;  %542 = vmatprep.mubr.bf16.mxu1 %v830_v3 }
  0x22   :  { %472 = vmatpush1.bf16.msra.mxu0 %v781_v5  ;;  %513 = vmatpush1.bf16.msra.mxu1 %v783_v6 }
  0x23   :  { %473 = vmatprep.subr.bf16.mxu0 %v798_v7  ;;  %514 = vmatprep.subr.bf16.mxu1 %v800_v8 }
  0x26   :  { %474 = vmatpush1.bf16.msra.mxu0 %v797_v13  ;;  %515 = vmatpush1.bf16.msra.mxu1 %v799_v14 }
  0x27   :  { %551 = vmatprep.subr.bf16.mxu0 %v770_v15  ;;  %592 = vmatprep.subr.bf16.mxu1 %v772_v16 }
  0x29   :  { %809 = vmatmul.mubr.msk.bf16.vlgmr.msra.gmra.mrb[8].mxu0 %vm301_vm0, %v911_v35  ;;  %810 = vmatmul.mubr.msk.bf16.vlgmr.msra.gmra.mrb[8].mxu1 %vm301_vm0, %v911_v35 }
  0x2a   :  { %552 = vmatpush1.bf16.msra.mxu0 %v769_v21  ;;  %593 = vmatpush1.bf16.msra.mxu1 %v771_v22 }
  0x2b   :  { %553 = vmatprep.subr.bf16.mxu0 %v786_v23  ;;  %594 = vmatprep.subr.bf16.mxu1 %v788_v24 }
  0x2c   :  { %583 = vmatprep.mubr.bf16.mxu0 %v830_v3  ;;  %624 = vmatprep.mubr.bf16.mxu1 %v830_v3 }
  0x2e   :  { %554 = vmatpush1.bf16.msra.mxu0 %v785_v29  ;;  %595 = vmatpush1.bf16.msra.mxu1 %v787_v30 }
  0x2f   :  { %555 = vmatprep.subr.bf16.mxu0 %v802_v31  ;;  %596 = vmatprep.subr.bf16.mxu1 %v804_v32 }
  0x32   :  { %556 = vmatpush1.bf16.msra.mxu0 %v801_v33  ;;  %597 = vmatpush1.bf16.msra.mxu1 %v803_v34 }
  0x35   :  { %811 = vmatmul.mubr.msk.bf16.vlgmr.msra.gmra.mrb[12].mxu0 %vm301_vm0, %v911_v35  ;;  %812 = vmatmul.mubr.msk.bf16.vlgmr.msra.gmra.mrb[12].mxu1 %vm301_vm0, %v911_v35 }
  0xe4   :  { %v339_v36 = vpop.f32.mrb[0].mxu0  ;;  %v380_v38 = vpop.f32.mrb[0].mxu1 }
  0xe5   :  { %vm633_vm1 = vcmp.gt.f32.partialorder %v339_v36, 0.0  ;;  %v649_v37 = vmul.f32 0.2, %v339_v36  ;;  %v341_v39 = vpop.f32.mrb[1].mxu0  ;;  %vm635_vm2 = vcmp.gt.f32.partialorder %v380_v38, 0.0  ;;  %v382_v42 = vpop.f32.mrb[1].mxu1 }
  0xe6   :  { %v651_v3 = vmul.f32 0.2, %v380_v38  ;;  %vm634_vm3 = vcmp.gt.f32.partialorder %v341_v39, 0.0  ;;  %v650_v40 = vmul.f32 0.2, %v341_v39  ;;  %v343_v43 = vpop.f32.mrb[2].mxu0 }
  0xe7   :  { %v665_v41 = vsel %vm633_vm1, %v339_v36, %v649_v37  ;;  %vm636_vm4 = vcmp.gt.f32.partialorder %v382_v42, 0.0  ;;  %v652_v46 = vmul.f32 0.2, %v382_v42  ;;  %v384_v47 = vpop.f32.mrb[2].mxu1  ;;  %v344_v48 = vpop.f32.mrb[3].mxu0 }
  0xe8   :  { %v667_v44 = vsel %vm635_vm2, %v380_v38, %v651_v3  ;;  %v666_v45 = vsel %vm634_vm3, %v341_v39, %v650_v40  ;;  %v385_v35 = vpop.f32.mrb[3].mxu1 }
  0xe9   :  { %v821_v49 = vpack.c.bf16 %v666_v45, %v665_v41  ;;  %v668_v50 = vsel %vm636_vm4, %v382_v42, %v652_v46 }
  0xea   :  { %v822_v51 = vpack.c.bf16 %v668_v50, %v667_v44 }
  0xeb   :  { %745 = vst [vmem:[%s1045_s2] sm:$0xff] %v821_v49 }
  0xec   :  { %746 = vst [vmem:[%s1045_s2 + $0x8] sm:$0xff] %v822_v51 }
  0xf0   :  { %v421_v52 = vpop.f32.mrb[4].mxu0  ;;  %v462_v54 = vpop.f32.mrb[4].mxu1 }
  0xf1   :  { %vm637_vm5 = vcmp.gt.f32.partialorder %v421_v52, 0.0  ;;  %v653_v53 = vmul.f32 0.2, %v421_v52  ;;  %v423_v55 = vpop.f32.mrb[5].mxu0  ;;  %vm639_vm6 = vcmp.gt.f32.partialorder %v462_v54, 0.0  ;;  %v464_v59 = vpop.f32.mrb[5].mxu1 }
  0xf2   :  { %v655_v56 = vmul.f32 0.2, %v462_v54  ;;  %vm638_vm7 = vcmp.gt.f32.partialorder %v423_v55, 0.0  ;;  %v654_v57 = vmul.f32 0.2, %v423_v55  ;;  %v425_v60 = vpop.f32.mrb[6].mxu0 }
  0xf3   :  { %v669_v58 = vsel %vm637_vm5, %v421_v52, %v653_v53  ;;  %vm640_vm8 = vcmp.gt.f32.partialorder %v464_v59, 0.0  ;;  %v656_v63 = vmul.f32 0.2, %v464_v59  ;;  %v466_v0 = vpop.f32.mrb[6].mxu1  ;;  %v426_v1 = vpop.f32.mrb[7].mxu0 }
  0xf4   :  { %v671_v61 = vsel %vm639_vm6, %v462_v54, %v655_v56  ;;  %v670_v62 = vsel %vm638_vm7, %v423_v55, %v654_v57  ;;  %v467_v4 = vpop.f32.mrb[7].mxu1 }
  0xf5   :  { %v823_v2 = vpack.c.bf16 %v670_v62, %v669_v58  ;;  %v672_v5 = vsel %vm640_vm8, %v464_v59, %v656_v63 }
  0xf6   :  { %v824_v6 = vpack.c.bf16 %v672_v5, %v671_v61 }
  0xf7   :  { %747 = vst [vmem:[%s1045_s2 + $0x10] sm:$0xff] %v823_v2 }
  0xf8   :  { %748 = vst [vmem:[%s1045_s2 + $0x18] sm:$0xff] %v824_v6 }
  0xfc   :  { %v503_v7 = vpop.f32.mrb[8].mxu0  ;;  %v544_v9 = vpop.f32.mrb[8].mxu1 }
  0xfd   :  { %vm641_vm9 = vcmp.gt.f32.partialorder %v503_v7, 0.0  ;;  %v657_v8 = vmul.f32 0.2, %v503_v7  ;;  %v505_v10 = vpop.f32.mrb[9].mxu0  ;;  %vm643_vm10 = vcmp.gt.f32.partialorder %v544_v9, 0.0  ;;  %v546_v14 = vpop.f32.mrb[9].mxu1 }
  0xfe   :  { %v659_v11 = vmul.f32 0.2, %v544_v9  ;;  %vm642_vm11 = vcmp.gt.f32.partialorder %v505_v10, 0.0  ;;  %v658_v12 = vmul.f32 0.2, %v505_v10  ;;  %v507_v15 = vpop.f32.mrb[10].mxu0 }
  0xff   :  { %v673_v13 = vsel %vm641_vm9, %v503_v7, %v657_v8  ;;  %vm644_vm12 = vcmp.gt.f32.partialorder %v546_v14, 0.0  ;;  %v660_v18 = vmul.f32 0.2, %v546_v14  ;;  %v548_v19 = vpop.f32.mrb[10].mxu1  ;;  %v508_v20 = vpop.f32.mrb[11].mxu0 }
 0x100   :  { %v675_v16 = vsel %vm643_vm10, %v544_v9, %v659_v11  ;;  %v674_v17 = vsel %vm642_vm11, %v505_v10, %v658_v12  ;;  %v549_v22 = vpop.f32.mrb[11].mxu1 }
 0x101   :  { %v825_v21 = vpack.c.bf16 %v674_v17, %v673_v13  ;;  %v676_v23 = vsel %vm644_vm12, %v546_v14, %v660_v18 }
 0x102   :  { %v826_v24 = vpack.c.bf16 %v676_v23, %v675_v16 }
 0x103   :  { %749 = vst [vmem:[%s1045_s2 + $0x20] sm:$0xff] %v825_v21 }
 0x104   :  { %750 = vst [vmem:[%s1045_s2 + $0x28] sm:$0xff] %v826_v24 }
 0x108   :  { %v585_v25 = vpop.f32.mrb[12].mxu0  ;;  %v626_v27 = vpop.f32.mrb[12].mxu1 }
 0x109   :  { %vm645_vm13 = vcmp.gt.f32.partialorder %v585_v25, 0.0  ;;  %v661_v26 = vmul.f32 0.2, %v585_v25  ;;  %v587_v28 = vpop.f32.mrb[13].mxu0  ;;  %vm647_vm14 = vcmp.gt.f32.partialorder %v626_v27, 0.0  ;;  %v628_v32 = vpop.f32.mrb[13].mxu1 }
 0x10a   :  { %v663_v29 = vmul.f32 0.2, %v626_v27  ;;  %vm646_vm15 = vcmp.gt.f32.partialorder %v587_v28, 0.0  ;;  %v662_v30 = vmul.f32 0.2, %v587_v28  ;;  %v589_v33 = vpop.f32.mrb[14].mxu0 }
 0x10b   :  { %v677_v31 = vsel %vm645_vm13, %v585_v25, %v661_v26  ;;  %vm648_vm0 = vcmp.gt.f32.partialorder %v628_v32, 0.0  ;;  %v664_v37 = vmul.f32 0.2, %v628_v32  ;;  %v630_v38 = vpop.f32.mrb[14].mxu1  ;;  %v590_v39 = vpop.f32.mrb[15].mxu0 }
 0x10c   :  { %v679_v34 = vsel %vm647_vm14, %v626_v27, %v663_v29  ;;  %v678_v36 = vsel %vm646_vm15, %v587_v28, %v662_v30  ;;  %v631_v40 = vpop.f32.mrb[15].mxu1 }
 0x10d   :  { %v827_v3 = vpack.c.bf16 %v678_v36, %v677_v31  ;;  %v680_v41 = vsel %vm648_vm0, %v628_v32, %v664_v37 }
 0x10e   :  { %v828_v42 = vpack.c.bf16 %v680_v41, %v679_v34 }
 0x10f   :  { %751 = vst [vmem:[%s1045_s2 + $0x30] sm:$0xff] %v827_v3 }
 0x110   :  { %752 = vst [vmem:[%s1045_s2 + $0x38] sm:$0xff] %v828_v42 }

// kernel: discriminator_forward.5
= control target key start
LH: loop header
LB: loop body
LE: loop exit
PB: predicated region body
PF: predicated region fallthrough
CT: control target
= control target key end

     0   :  { %v548_v1 = vmov 0   ;;  %s737_s1 = inlined_call_operand.vmem [shape: bf16[128,512], index: 1, kind: input, shape index: {}]   ;;  %s738_s0 = inlined_call_operand.vmem [shape: bf16[16,128], index: 0, kind: input, shape index: {}]   ;;  %s739_s2 = inlined_call_operand.vmem [shape: f32[16,1], index: 2, kind: input, shape index: {}]   ;;  %s740_s3 = inlined_call_operand.vmem [shape: f32[16,1], index: 3, kind: input, shape index: {}]   ;;  %s741_s4 = inlined_call_operand.vmem [shape: bf16[16,512], index: 4, kind: output, shape index: {}]  }
   0x1   :  { %v495_v0 = vld [vmem:[%s737_s1 + $0x4] ss:$16 sps:$4 sm:$0xff]   ;;  %250 = vmatprep.mubr.bf16.mxu0 %v548_v1  ;;  %293 = vmatprep.mubr.bf16.mxu1 %v548_v1  ;;  %v497_v2 = vld [vmem:[%s737_s1 + $0xc] ss:$16 sps:$4 sm:$0xff]   ;;  %v499_v3 = vld [vmem:[%s737_s1] ss:$16 sps:$4 sm:$0xff]  }
   0x2   :  { %493 = vset.pattern.permute.xlu0 %v548_v1  ;;  %494 = vset.pattern.permute.xlu1 %v548_v1  ;;  %v500_v4 = vld [vmem:[%s737_s1 + $0x8] ss:$16 sps:$4 sm:$0xff]   ;;  %v501_v5 = vld [vmem:[%s737_s1 + $0x24] ss:$16 sps:$4 sm:$0xff]   ;;  %v503_v6 = vld [vmem:[%s737_s1 + $0x2c] ss:$16 sps:$4 sm:$0xff]  }
   0x3   :  { %218 = vmatprep.subr.bf16.mxu0 %v495_v0  ;;  %261 = vmatprep.subr.bf16.mxu1 %v497_v2  ;;  %v505_v7 = vld [vmem:[%s737_s1 + $0x20] ss:$16 sps:$4 sm:$0xff]   ;;  %v506_v8 = vld [vmem:[%s737_s1 + $0x28] ss:$16 sps:$4 sm:$0xff]   ;;  %v507_v9 = vld [vmem:[%s737_s1 + $0x44] ss:$16 sps:$4 sm:$0xff]  }
   0x4   :  { %219 = vmatpush1.bf16.msra.mxu0 %v499_v3  ;;  %262 = vmatpush1.bf16.msra.mxu1 %v500_v4  ;;  %v509_v10 = vld [vmem:[%s737_s1 + $0x4c] ss:$16 sps:$4 sm:$0xff]   ;;  %v511_v11 = vld [vmem:[%s737_s1 + $0x40] ss:$16 sps:$4 sm:$0xff]   ;;  %v512_v12 = vld [vmem:[%s737_s1 + $0x48] ss:$16 sps:$4 sm:$0xff]  }
   0x5   :  { %220 = vmatprep.subr.bf16.mxu0 %v501_v5  ;;  %263 = vmatprep.subr.bf16.mxu1 %v503_v6  ;;  %v513_v13 = vld [vmem:[%s737_s1 + $0x64] ss:$16 sps:$4 sm:$0xff]   ;;  %v515_v14 = vld [vmem:[%s737_s1 + $0x6c] ss:$16 sps:$4 sm:$0xff]   ;;  %v517_v15 = vld [vmem:[%s737_s1 + $0x60] ss:$16 sps:$4 sm:$0xff]  }
   0x6   :  { %v518_v16 = vld [vmem:[%s737_s1 + $0x68] ss:$16 sps:$4 sm:$0xff]   ;;  %v519_v17 = vld [vmem:[%s737_s1 + $0x84] ss:$16 sps:$4 sm:$0xff]   ;;  %v521_v18 = vld [vmem:[%s737_s1 + $0x8c] ss:$16 sps:$4 sm:$0xff]  }
   0x7   :  { %v523_v19 = vld [vmem:[%s737_s1 + $0x80] ss:$16 sps:$4 sm:$0xff]   ;;  %v524_v20 = vld [vmem:[%s737_s1 + $0x88] ss:$16 sps:$4 sm:$0xff]   ;;  %v525_v21 = vld [vmem:[%s737_s1 + $0xa4] ss:$16 sps:$4 sm:$0xff]  }
   0x8   :  { %221 = vmatpush1.bf16.msra.mxu0 %v505_v7  ;;  %264 = vmatpush1.bf16.msra.mxu1 %v506_v8  ;;  %v527_v22 = vld [vmem:[%s737_s1 + $0xac] ss:$16 sps:$4 sm:$0xff]   ;;  %v529_v23 = vld [vmem:[%s737_s1 + $0xa0] ss:$16 sps:$4 sm:$0xff]   ;;  %v530_v24 = vld [vmem:[%s737_s1 + $0xa8] ss:$16 sps:$4 sm:$0xff]  }
   0x9   :  { %222 = vmatprep.subr.bf16.mxu0 %v507_v9  ;;  %265 = vmatprep.subr.bf16.mxu1 %v509_v10  ;;  %v531_v25 = vld [vmem:[%s737_s1 + $0xc4] ss:$16 sps:$4 sm:$0xff]   ;;  %v533_v26 = vld [vmem:[%s737_s1 + $0xcc] ss:$16 sps:$4 sm:$0xff]   ;;  %v535_v27 = vld [vmem:[%s737_s1 + $0xc0] ss:$16 sps:$4 sm:$0xff]  }
   0xa   :  { %v536_v28 = vld [vmem:[%s737_s1 + $0xc8] ss:$16 sps:$4 sm:$0xff]   ;;  %v537_v29 = vld [vmem:[%s737_s1 + $0xe4] ss:$16 sps:$4 sm:$0xff]   ;;  %v539_v30 = vld [vmem:[%s737_s1 + $0xec] ss:$16 sps:$4 sm:$0xff]  }
   0xb   :  { %v541_v31 = vld [vmem:[%s737_s1 + $0xe0] ss:$16 sps:$4 sm:$0xff]   ;;  %v542_v32 = vld [vmem:[%s737_s1 + $0xe8] ss:$16 sps:$4 sm:$0xff]  }
   0xc   :  { %223 = vmatpush1.bf16.msra.mxu0 %v511_v11  ;;  %266 = vmatpush1.bf16.msra.mxu1 %v512_v12  ;;  %v543_v33 = vld [vmem:[%s738_s0] sm:$0xff]  }
   0xd   :  { %224 = vmatprep.subr.bf16.mxu0 %v513_v13  ;;  %267 = vmatprep.subr.bf16.mxu1 %v515_v14 }
  0x10   :  { %225 = vmatpush1.bf16.msra.mxu0 %v517_v15  ;;  %268 = vmatpush1.bf16.msra.mxu1 %v518_v16  ;;  %v345_v16 = vld [vmem:[%s739_s2] sm:$0xff] }
  0x11   :  { %226 = vmatprep.subr.bf16.mxu0 %v519_v17  ;;  %269 = vmatprep.subr.bf16.mxu1 %v521_v18 }
  0x14   :  { %227 = vmatpush1.bf16.msra.mxu0 %v523_v19  ;;  %270 = vmatpush1.bf16.msra.mxu1 %v524_v20  ;;  %v346_v19 = vld [vmem:[%s739_s2 + $0x8] sm:$0xff] }
  0x15   :  { %228 = vmatprep.subr.bf16.mxu0 %v525_v21  ;;  %271 = vmatprep.subr.bf16.mxu1 %v527_v22 }
  0x18   :  { %229 = vmatpush1.bf16.msra.mxu0 %v529_v23  ;;  %272 = vmatpush1.bf16.msra.mxu1 %v530_v24  ;;  %v353_v23 = vld [vmem:[%s740_s3] sm:$0xff] }
  0x19   :  { %230 = vmatprep.subr.bf16.mxu0 %v531_v25  ;;  %273 = vmatprep.subr.bf16.mxu1 %v533_v26  ;;  %v354_v26 = vld [vmem:[%s740_s3 + $0x8] sm:$0xff] }
  0x1c   :  { %231 = vmatpush1.bf16.msra.mxu0 %v535_v27  ;;  %274 = vmatpush1.bf16.msra.mxu1 %v536_v28 }
  0x1d   :  { %232 = vmatprep.subr.bf16.mxu0 %v537_v29  ;;  %275 = vmatprep.subr.bf16.mxu1 %v539_v30 }
  0x20   :  { %233 = vmatpush1.bf16.msra.mxu0 %v541_v31  ;;  %276 = vmatpush1.bf16.msra.mxu1 %v542_v32 }
  0x23   :  { %251 = vmatmul.mubr.bf16.vlgmr.msra.gmra.mrb[0].mxu0 %v543_v33  ;;  %294 = vmatmul.mubr.bf16.vlgmr.msra.gmra.mrb[0].mxu1 %v543_v33 }
  0xf6   :  { %v673_v34 = vpop.f32.mrb[0].mxu0  ;;  %v675_v35 = vpop.f32.mrb[0].mxu1 }
  0xf7   :  { %v677_v36 = vpop.f32.mrb[1].mxu0  ;;  %v679_v37 = vpop.f32.mrb[1].mxu1 }
  0xf8   :  { %v304_v38 = vadd.f32 %v677_v36, %v673_v34  ;;  %v683_v39 = vpop.f32.mrb[2].mxu0  ;;  %v685_v40 = vpop.f32.mrb[2].mxu1 }
  0xf9   :  { %v687_v41 = vpop.f32.mrb[3].mxu0  ;;  %v689_v42 = vpop.f32.mrb[3].mxu1 }
  0xfa   :  { %v309_v43 = vadd.f32 %v687_v41, %v683_v39  ;;  %v305_v44 = vadd.f32 %v304_v38, %v675_v35 }
  0xfc   :  { %v306_v45 = vadd.f32 %v305_v44, %v679_v37  ;;  %v310_v46 = vadd.f32 %v309_v43, %v685_v40 }
  0xfe   :  { %307 = vadd.xlane.f32.xlu0 %v306_v45  ;;  %v311_v47 = vadd.f32 %v310_v46, %v689_v42 }
 0x102   :  { %312 = vadd.xlane.f32.xlu0 %v311_v47 }
 0x18b   :  { %v308_v48 = vpop.xlane.xlu0 %307 }
 0x18c   :  { %v315_v49 = vmul.f32 0.001953125, %v308_v48 }
 0x18e   :  { %v317_v50 = vsub.f32 %v673_v34, %v315_v49  ;;  %v318_v51 = vsub.f32 %v677_v36, %v315_v49  ;;  %v319_v52 = vsub.f32 %v675_v35, %v315_v49  ;;  %v320_v54 = vsub.f32 %v679_v37, %v315_v49 }
 0x18f   :  { %v313_v53 = vpop.xlane.xlu0 %312 }
 0x190   :  { %v316_v55 = vmul.f32 0.001953125, %v313_v53  ;;  %v325_v56 = vmul.f32 %v317_v50, %v317_v50  ;;  %v326_v57 = vmul.f32 %v318_v51, %v318_v51  ;;  %v327_v58 = vmul.f32 %v319_v52, %v319_v52 }
 0x191   :  { %v328_v63 = vmul.f32 %v320_v54, %v320_v54 }
 0x192   :  { %v333_v59 = vadd.f32 %v326_v57, %v325_v56  ;;  %v321_v60 = vsub.f32 %v683_v39, %v316_v55  ;;  %v322_v61 = vsub.f32 %v687_v41, %v316_v55  ;;  %v323_v62 = vsub.f32 %v685_v40, %v316_v55 }
 0x193   :  { %v324_v1 = vsub.f32 %v689_v42, %v316_v55 }
 0x194   :  { %v334_v0 = vadd.f32 %v333_v59, %v327_v58  ;;  %v329_v2 = vmul.f32 %v321_v60, %v321_v60  ;;  %v330_v3 = vmul.f32 %v322_v61, %v322_v61  ;;  %v331_v5 = vmul.f32 %v323_v62, %v323_v62 }
 0x195   :  { %v332_v7 = vmul.f32 %v324_v1, %v324_v1 }
 0x196   :  { %v335_v4 = vadd.f32 %v334_v0, %v328_v63  ;;  %v338_v6 = vadd.f32 %v330_v3, %v329_v2 }
 0x198   :  { %336 = vadd.xlane.f32.xlu1 %v335_v4  ;;  %v339_v8 = vadd.f32 %v338_v6, %v331_v5 }
 0x19a   :  { %v340_v9 = vadd.f32 %v339_v8, %v332_v7 }
 0x19c   :  { %341 = vadd.xlane.f32.xlu1 %v340_v9 }
 0x225   :  { %v337_v10 = vpop.xlane.xlu1 %336 }
 0x226   :  { %v343_v11 = vmul.f32 0.001953125, %v337_v10 }
 0x228   :  { %v347_v12 = vadd.f32 1e-05, %v343_v11 }
 0x229   :  { %v342_v13 = vpop.xlane.xlu1 %341 }
 0x22a   :  { %544 = vrsqrt.f32 %v347_v12  ;;  %v344_v14 = vmul.f32 0.001953125, %v342_v13 }
 0x22c   :  { %v348_v15 = vadd.f32 1e-05, %v344_v14 }
 0x22e   :  { %546 = vrsqrt.f32 %v348_v15 }
 0x234   :  { %v545_v17 = vpop.eup %544 }
 0x235   :  { %v351_v18 = vmul.f32 %v545_v17, %v345_v16 }
 0x237   :  { %361 = vperm.xlu0 %493, %v351_v18   ;;  %v355_v22 = vmul.f32 %v351_v18, %v315_v49 }
 0x238   :  { %v547_v20 = vpop.eup %546 }
 0x239   :  { %v352_v21 = vmul.f32 %v547_v20, %v346_v19  ;;  %v357_v24 = vsub.f32 %v353_v23, %v355_v22 }
 0x23b   :  { %366 = vperm.xlu1 %494, %v352_v21   ;;  %v356_v25 = vmul.f32 %v352_v21, %v316_v55 }
 0x23d   :  { %v358_v27 = vsub.f32 %v354_v26, %v356_v25 }
 0x23f   :  { %379 = vperm.xlu1 %494, %v357_v24  }
 0x243   :  { %384 = vperm.xlu1 %494, %v358_v27  }
 0x2b6   :  { %v362_v28 = vpop.permute.xlu0 %361 }
 0x2b7   :  { %v369_v30 = vmul.f32 %v362_v28, %v673_v34  ;;  %v370_v31 = vmul.f32 %v362_v28, %v677_v36  ;;  %v371_v32 = vmul.f32 %v362_v28, %v675_v35  ;;  %v372_v33 = vmul.f32 %v362_v28, %v679_v37 }
 0x2ba   :  { %v367_v29 = vpop.permute.xlu1 %366 }
 0x2bb   :  { %v373_v47 = vmul.f32 %v367_v29, %v683_v39  ;;  %v374_v48 = vmul.f32 %v367_v29, %v687_v41  ;;  %v375_v49 = vmul.f32 %v367_v29, %v685_v40  ;;  %v376_v37 = vmul.f32 %v367_v29, %v689_v42 }
 0x2be   :  { %v380_v38 = vpop.permute.xlu1 %379 }
 0x2bf   :  { %v387_v43 = vadd.f32 %v380_v38, %v369_v30  ;;  %v388_v44 = vadd.f32 %v380_v38, %v370_v31  ;;  %v389_v45 = vadd.f32 %v380_v38, %v371_v32  ;;  %v390_v46 = vadd.f32 %v380_v38, %v372_v33 }
 0x2c1   :  { %vm395_vm0 = vcmp.gt.f32.partialorder %v387_v43, 0.0  ;;  %vm396_vm1 = vcmp.gt.f32.partialorder %v388_v44, 0.0  ;;  %vm397_vm2 = vcmp.gt.f32.partialorder %v389_v45, 0.0  ;;  %vm398_vm3 = vcmp.gt.f32.partialorder %v390_v46, 0.0 }
 0x2c2   :  { %v403_v34 = vmul.f32 0.2, %v387_v43  ;;  %v404_v36 = vmul.f32 0.2, %v388_v44  ;;  %v405_v35 = vmul.f32 0.2, %v389_v45  ;;  %v385_v50 = vpop.permute.xlu1 %384 }
 0x2c3   :  { %v406_v51 = vmul.f32 0.2, %v390_v46  ;;  %v391_v52 = vadd.f32 %v385_v50, %v373_v47  ;;  %v392_v53 = vadd.f32 %v385_v50, %v374_v48  ;;  %v393_v54 = vadd.f32 %v385_v50, %v375_v49 }
 0x2c4   :  { %v411_v55 = vsel %vm395_vm0, %v387_v43, %v403_v34  ;;  %v412_v39 = vsel %vm396_vm1, %v388_v44, %v404_v36  ;;  %v413_v56 = vsel %vm397_vm2, %v389_v45, %v405_v35  ;;  %v394_v41 = vadd.f32 %v385_v50, %v376_v37 }
 0x2c5   :  { %v414_v57 = vsel %vm398_vm3, %v390_v46, %v406_v51  ;;  %v488_v40 = vpack.c.bf16 %v412_v39, %v411_v55  ;;  %vm399_vm4 = vcmp.gt.f32.partialorder %v391_v52, 0.0  ;;  %vm400_vm5 = vcmp.gt.f32.partialorder %v392_v53, 0.0 }
 0x2c6   :  { %v489_v58 = vpack.c.bf16 %v414_v57, %v413_v56  ;;  %vm401_vm6 = vcmp.gt.f32.partialorder %v393_v54, 0.0  ;;  %vm402_vm7 = vcmp.gt.f32.partialorder %v394_v41, 0.0  ;;  %v407_v59 = vmul.f32 0.2, %v391_v52 }
 0x2c7   :  { %443 = vst [vmem:[%s741_s4] sm:$0xff] %v488_v40  ;;  %v408_v42 = vmul.f32 0.2, %v392_v53  ;;  %v409_v60 = vmul.f32 0.2, %v393_v54  ;;  %v410_v61 = vmul.f32 0.2, %v394_v41 }
 0x2c8   :  { %444 = vst [vmem:[%s741_s4 + $0x8] sm:$0xff] %v489_v58  ;;  %v415_v62 = vsel %vm399_vm4, %v391_v52, %v407_v59 }
 0x2c9   :  { %v416_v63 = vsel %vm400_vm5, %v392_v53, %v408_v42  ;;  %v417_v0 = vsel %vm401_vm6, %v393_v54, %v409_v60  ;;  %v418_v1 = vsel %vm402_vm7, %v394_v41, %v410_v61 }
 0x2ca   :  { %v490_v2 = vpack.c.bf16 %v416_v63, %v415_v62  ;;  %v491_v3 = vpack.c.bf16 %v418_v1, %v417_v0 }
 0x2cc   :  { %445 = vst [vmem:[%s741_s4 + $0x10] sm:$0xff] %v490_v2  ;;  %446 = vst [vmem:[%s741_s4 + $0x18] sm:$0xff] %v491_v3 }

// kernel: discriminator_forward.6
= control target key start
LH: loop header
LB: loop body
LE: loop exit
PB: predicated region body
PF: predicated region fallthrough
CT: control target
= control target key end

     0   :  { %v480_v48 = vmov 0   ;;  %s616_s1 = inlined_call_operand.vmem [shape: bf16[256,128], index: 1, kind: input, shape index: {}]   ;;  %s617_s0 = inlined_call_operand.vmem [shape: bf16[32,256], index: 0, kind: input, shape index: {}]   ;;  %s618_s2 = inlined_call_operand.vmem [shape: f32[32,1], index: 2, kind: input, shape index: {}]   ;;  %s619_s3 = inlined_call_operand.vmem [shape: f32[32,1], index: 3, kind: input, shape index: {}]   ;;  %s620_s4 = inlined_call_operand.vmem [shape: bf16[32,128], index: 4, kind: output, shape index: {}]  }
   0x1   :  { %v450_v0 = vld [vmem:[%s616_s1 + $0x40] sm:$0xff]   ;;  %v452_v2 = vld [vmem:[%s616_s1 + $0x48] sm:$0xff]   ;;  %v454_v4 = vld [vmem:[%s616_s1 + $0x50] sm:$0xff]   ;;  %448 = vset.pattern.permute.xlu0 %v480_v48  ;;  %449 = vset.pattern.permute.xlu1 %v480_v48 }
   0x2   :  { %v451_v1 = vld [vmem:[%s616_s1] sm:$0xff]   ;;  %403 = vmatprep.subr.bf16.mxu0 %v450_v0  ;;  %431 = vmatprep.subr.bf16.mxu1 %v450_v0  ;;  %v453_v3 = vld [vmem:[%s616_s1 + $0x8] sm:$0xff]   ;;  %v455_v5 = vld [vmem:[%s616_s1 + $0x10] sm:$0xff]  }
   0x3   :  { %404 = vmatpush3.bf16.msra.mxu0 %v451_v1  ;;  %439 = vmatpush3.bf16.msra.mxu1 %v451_v1  ;;  %v456_v6 = vld [vmem:[%s616_s1 + $0x58] sm:$0xff]   ;;  %v458_v8 = vld [vmem:[%s616_s1 + $0x60] sm:$0xff]   ;;  %v460_v10 = vld [vmem:[%s616_s1 + $0x68] sm:$0xff]  }
   0x4   :  { %405 = vmatprep.subr.bf16.mxu0 %v452_v2  ;;  %432 = vmatprep.subr.bf16.mxu1 %v452_v2  ;;  %v457_v7 = vld [vmem:[%s616_s1 + $0x18] sm:$0xff]   ;;  %v459_v9 = vld [vmem:[%s616_s1 + $0x20] sm:$0xff]   ;;  %v461_v13 = vld [vmem:[%s616_s1 + $0x28] sm:$0xff]  }
   0x5   :  { %v468_v11 = vld [vmem:[%s617_s0 + $0x4] ss:$8 sps:$4 sm:$0xff]   ;;  %v471_v12 = vld [vmem:[%s617_s0 + $0x14] ss:$8 sps:$4 sm:$0xff]   ;;  %v466_v18 = vld [vmem:[%s617_s0] ss:$8 sps:$4 sm:$0xff]  }
   0x6   :  { %v462_v14 = vld [vmem:[%s616_s1 + $0x70] sm:$0xff]   ;;  %202 = vmatprep.mubr.bf16.mxu0 %v468_v11  ;;  %210 = vmatprep.mubr.bf16.mxu1 %v471_v12  ;;  %v464_v16 = vld [vmem:[%s616_s1 + $0x78] sm:$0xff]   ;;  %v252_v61 = vld [vmem:[%s618_s2] sm:$0xff] }
   0x7   :  { %406 = vmatpush3.bf16.msra.mxu0 %v453_v3  ;;  %440 = vmatpush3.bf16.msra.mxu1 %v453_v3  ;;  %v463_v15 = vld [vmem:[%s616_s1 + $0x30] sm:$0xff]   ;;  %v465_v17 = vld [vmem:[%s616_s1 + $0x38] sm:$0xff]  }
   0x8   :  { %407 = vmatprep.subr.bf16.mxu0 %v454_v4  ;;  %433 = vmatprep.subr.bf16.mxu1 %v454_v4  ;;  %v469_v19 = vld [vmem:[%s617_s0 + $0x10] ss:$8 sps:$4 sm:$0xff]   ;;  %v253_v4 = vld [vmem:[%s618_s2 + $0x8] sm:$0xff] }
   0x9   :  { %v254_v0 = vld [vmem:[%s618_s2 + $0x10] sm:$0xff] }
   0xb   :  { %408 = vmatpush3.bf16.msra.mxu0 %v455_v5  ;;  %441 = vmatpush3.bf16.msra.mxu1 %v455_v5 }
   0xc   :  { %409 = vmatprep.subr.bf16.mxu0 %v456_v6  ;;  %434 = vmatprep.subr.bf16.mxu1 %v456_v6 }
   0xf   :  { %410 = vmatpush3.bf16.msra.mxu0 %v457_v7  ;;  %442 = vmatpush3.bf16.msra.mxu1 %v457_v7  ;;  %v255_v7 = vld [vmem:[%s618_s2 + $0x18] sm:$0xff] }
  0x10   :  { %411 = vmatprep.subr.bf16.mxu0 %v458_v8  ;;  %435 = vmatprep.subr.bf16.mxu1 %v458_v8 }
  0x13   :  { %412 = vmatpush3.bf16.msra.mxu0 %v459_v9  ;;  %443 = vmatpush3.bf16.msra.mxu1 %v459_v9 }
  0x14   :  { %413 = vmatprep.subr.bf16.mxu0 %v460_v10  ;;  %436 = vmatprep.subr.bf16.mxu1 %v460_v10  ;;  %v268_v10 = vld [vmem:[%s619_s3] sm:$0xff] }
  0x17   :  { %414 = vmatpush3.bf16.msra.mxu0 %v461_v13  ;;  %444 = vmatpush3.bf16.msra.mxu1 %v461_v13  ;;  %v270_v13 = vld [vmem:[%s619_s3 + $0x10] sm:$0xff] }
  0x18   :  { %415 = vmatprep.subr.bf16.mxu0 %v462_v14  ;;  %437 = vmatprep.subr.bf16.mxu1 %v462_v14 }
  0x1b   :  { %416 = vmatpush3.bf16.msra.mxu0 %v463_v15  ;;  %445 = vmatpush3.bf16.msra.mxu1 %v463_v15 }
  0x1c   :  { %417 = vmatprep.subr.bf16.mxu0 %v464_v16  ;;  %438 = vmatprep.subr.bf16.mxu1 %v464_v16  ;;  %v269_v16 = vld [vmem:[%s619_s3 + $0x8] sm:$0xff] }
  0x1f   :  { %418 = vmatpush3.bf16.msra.mxu0 %v465_v17  ;;  %446 = vmatpush3.bf16.msra.mxu1 %v465_v17 }
  0x22   :  { %203 = vmatmul.mubr.bf16.vlgmr.msra.gmra.mrb[0].mxu0 %v466_v18  ;;  %211 = vmatmul.mubr.bf16.vlgmr.msra.gmra.mrb[0].mxu1 %v469_v19  ;;  %v271_v19 = vld [vmem:[%s619_s3 + $0x18] sm:$0xff] }
  0xf5   :  { %v419_v20 = vpop.f32.mrb[0].mxu0  ;;  %v425_v21 = vpop.f32.mrb[0].mxu1 }
  0xf6   :  { %v420_v22 = vpop.f32.mrb[1].mxu0  ;;  %v426_v23 = vpop.f32.mrb[1].mxu1 }
  0xf7   :  { %v566_v24 = vadd.f32 %v420_v22, %v419_v20  ;;  %v568_v25 = vadd.f32 %v426_v23, %v425_v21  ;;  %v422_v26 = vpop.f32.mrb[2].mxu0  ;;  %v428_v27 = vpop.f32.mrb[2].mxu1 }
  0xf8   :  { %v423_v28 = vpop.f32.mrb[3].mxu0  ;;  %v429_v29 = vpop.f32.mrb[3].mxu1 }
  0xf9   :  { %v570_v30 = vadd.f32 %v423_v28, %v422_v26  ;;  %v572_v31 = vadd.f32 %v429_v29, %v428_v27  ;;  %223 = vadd.xlane.f32.xlu1 %v568_v25  ;;  %219 = vadd.xlane.f32.xlu0 %v566_v24 }
  0xfd   :  { %225 = vadd.xlane.f32.xlu1 %v572_v31  ;;  %221 = vadd.xlane.f32.xlu0 %v570_v30 }
 0x186   :  { %v224_v32 = vpop.xlane.xlu1 %223  ;;  %v220_v33 = vpop.xlane.xlu0 %219 }
 0x187   :  { %v230_v34 = vmul.f32 0.0078125, %v224_v32  ;;  %v228_v35 = vmul.f32 0.0078125, %v220_v33 }
 0x189   :  { %v232_v36 = vsub.f32 %v566_v24, %v228_v35  ;;  %v234_v42 = vsub.f32 %v568_v25, %v230_v34 }
 0x18a   :  { %v226_v37 = vpop.xlane.xlu1 %225  ;;  %v222_v38 = vpop.xlane.xlu0 %221 }
 0x18b   :  { %v231_v39 = vmul.f32 0.0078125, %v226_v37  ;;  %v229_v40 = vmul.f32 0.0078125, %v222_v38  ;;  %v236_v41 = vmul.f32 %v232_v36, %v232_v36  ;;  %v238_v44 = vmul.f32 %v234_v42, %v234_v42 }
 0x18d   :  { %240 = vadd.xlane.f32.xlu0 %v236_v41  ;;  %v233_v43 = vsub.f32 %v570_v30, %v229_v40  ;;  %v235_v46 = vsub.f32 %v572_v31, %v231_v39 }
 0x18f   :  { %v237_v45 = vmul.f32 %v233_v43, %v233_v43  ;;  %v239_v47 = vmul.f32 %v235_v46, %v235_v46 }
 0x191   :  { %244 = vadd.xlane.f32.xlu0 %v238_v44  ;;  %242 = vadd.xlane.f32.xlu1 %v237_v45 }
 0x195   :  { %246 = vadd.xlane.f32.xlu1 %v239_v47 }
 0x21a   :  { %v241_v49 = vpop.xlane.xlu0 %240 }
 0x21b   :  { %v248_v50 = vmul.f32 0.0078125, %v241_v49 }
 0x21d   :  { %v256_v51 = vadd.f32 1e-05, %v248_v50 }
 0x21e   :  { %v243_v52 = vpop.xlane.xlu1 %242  ;;  %v245_v53 = vpop.xlane.xlu0 %244 }
 0x21f   :  { %472 = vrsqrt.f32 %v256_v51  ;;  %v249_v54 = vmul.f32 0.0078125, %v243_v52  ;;  %v250_v55 = vmul.f32 0.0078125, %v245_v53 }
 0x221   :  { %v258_v56 = vadd.f32 1e-05, %v250_v55  ;;  %v257_v57 = vadd.f32 1e-05, %v249_v54 }
 0x222   :  { %v247_v58 = vpop.xlane.xlu1 %246 }
 0x223   :  { %v251_v59 = vmul.f32 0.0078125, %v247_v58  ;;  %474 = vrsqrt.f32 %v258_v56 }
 0x224   :  { %476 = vrsqrt.f32 %v257_v57 }
 0x225   :  { %v259_v60 = vadd.f32 1e-05, %v251_v59 }
 0x227   :  { %478 = vrsqrt.f32 %v259_v60 }
 0x229   :  { %v473_v62 = vpop.eup %472 }
 0x22a   :  { %v264_v63 = vmul.f32 %v473_v62, %v252_v61 }
 0x22c   :  { %282 = vperm.xlu0 %448, %v264_v63   ;;  %v272_v9 = vmul.f32 %v264_v63, %v228_v35 }
 0x22d   :  { %v475_v1 = vpop.eup %474 }
 0x22e   :  { %v266_v2 = vmul.f32 %v475_v1, %v254_v0  ;;  %v477_v3 = vpop.eup %476  ;;  %v276_v11 = vsub.f32 %v268_v10, %v272_v9 }
 0x22f   :  { %v265_v5 = vmul.f32 %v477_v3, %v253_v4 }
 0x230   :  { %292 = vperm.xlu1 %449, %v266_v2   ;;  %v274_v12 = vmul.f32 %v266_v2, %v230_v34 }
 0x231   :  { %v479_v6 = vpop.eup %478  ;;  %v273_v15 = vmul.f32 %v265_v5, %v229_v40 }
 0x232   :  { %v267_v8 = vmul.f32 %v479_v6, %v255_v7  ;;  %v278_v14 = vsub.f32 %v270_v13, %v274_v12 }
 0x233   :  { %v277_v17 = vsub.f32 %v269_v16, %v273_v15 }
 0x234   :  { %287 = vperm.xlu1 %449, %v265_v5   ;;  %v275_v18 = vmul.f32 %v267_v8, %v231_v39 }
 0x236   :  { %v279_v20 = vsub.f32 %v271_v19, %v275_v18 }
 0x238   :  { %297 = vperm.xlu1 %449, %v267_v8  }
 0x23c   :  { %306 = vperm.xlu1 %449, %v276_v11  }
 0x240   :  { %316 = vperm.xlu1 %449, %v278_v14  }
 0x244   :  { %311 = vperm.xlu1 %449, %v277_v17  }
 0x248   :  { %321 = vperm.xlu1 %449, %v279_v20  }
 0x2ab   :  { %v283_v26 = vpop.permute.xlu0 %282 }
 0x2ac   :  { %v300_v28 = vmul.f32 %v566_v24, %v283_v26 }
 0x2af   :  { %v293_v21 = vpop.permute.xlu1 %292 }
 0x2b0   :  { %v302_v33 = vmul.f32 %v568_v25, %v293_v21 }
 0x2b3   :  { %v288_v22 = vpop.permute.xlu1 %287 }
 0x2b4   :  { %v301_v34 = vmul.f32 %v570_v30, %v288_v22 }
 0x2b7   :  { %v298_v23 = vpop.permute.xlu1 %297 }
 0x2b8   :  { %v303_v39 = vmul.f32 %v572_v31, %v298_v23 }
 0x2bb   :  { %v307_v27 = vpop.permute.xlu1 %306 }
 0x2bc   :  { %v324_v32 = vadd.f32 %v307_v27, %v300_v28 }
 0x2be   :  { %v332_v36 = vmul.f32 0.2, %v324_v32  ;;  %vm328_vm0 = vcmp.gt.f32.partialorder %v324_v32, 0.0 }
 0x2bf   :  { %v317_v29 = vpop.permute.xlu1 %316 }
 0x2c0   :  { %v326_v37 = vadd.f32 %v317_v29, %v302_v33  ;;  %v336_v42 = vsel %vm328_vm0, %v324_v32, %v332_v36 }
 0x2c2   :  { %v334_v43 = vmul.f32 0.2, %v326_v37  ;;  %vm330_vm2 = vcmp.gt.f32.partialorder %v326_v37, 0.0 }
 0x2c3   :  { %v312_v35 = vpop.permute.xlu1 %311 }
 0x2c4   :  { %v325_v38 = vadd.f32 %v312_v35, %v301_v34  ;;  %v338_v30 = vsel %vm330_vm2, %v326_v37, %v334_v43 }
 0x2c6   :  { %vm329_vm1 = vcmp.gt.f32.partialorder %v325_v38, 0.0  ;;  %v333_v40 = vmul.f32 0.2, %v325_v38 }
 0x2c7   :  { %v322_v41 = vpop.permute.xlu1 %321 }
 0x2c8   :  { %v337_v44 = vsel %vm329_vm1, %v325_v38, %v333_v40  ;;  %v327_v24 = vadd.f32 %v322_v41, %v303_v39 }
 0x2c9   :  { %v395_v45 = vpack.c.bf16 %v337_v44, %v336_v42 }
 0x2ca   :  { %vm331_vm3 = vcmp.gt.f32.partialorder %v327_v24, 0.0  ;;  %v335_v25 = vmul.f32 0.2, %v327_v24 }
 0x2cb   :  { %396 = vst [vmem:[%s620_s4] sm:$0xff] %v395_v45  }
 0x2cc   :  { %v339_v46 = vsel %vm331_vm3, %v327_v24, %v335_v25 }
 0x2cd   :  { %v400_v47 = vpack.c.bf16 %v339_v46, %v338_v30 }
 0x2cf   :  { %402 = vst [vmem:[%s620_s4 + $0x8] sm:$0xff] %v400_v47  }

// kernel: discriminator_forward.7
= control target key start
LH: loop header
LB: loop body
LE: loop exit
PB: predicated region body
PF: predicated region fallthrough
CT: control target
= control target key end

     0   :  { %vm500_vm0 = vcmask 261120   ;;  %vm790_vm3 = vcmask 257024   ;;  %s1360_s1 = inlined_call_operand.vmem [shape: bf16[512,32], index: 1, kind: input, shape index: {}]   ;;  %s1361_s0 = inlined_call_operand.vmem [shape: bf16[64,512], index: 0, kind: input, shape index: {}]   ;;  %s1362_s2 = inlined_call_operand.vmem [shape: f32[64,1], index: 2, kind: input, shape index: {}]   ;;  %s1363_s3 = inlined_call_operand.vmem [shape: f32[64,1], index: 3, kind: input, shape index: {}]   ;;  %s1364_s4 = inlined_call_operand.vmem [shape: bf16[64,32], index: 4, kind: output, shape index: {}]  }
   0x1   :  { %v950_v0 = vld [vmem:[%s1360_s1 + $0x40] sm:$0xff]   ;;  %v954_v4 = vld [vmem:[%s1360_s1 + $0x48] sm:$0xff]   ;;  %v958_v8 = vld [vmem:[%s1360_s1 + $0x50] sm:$0xff]  }
   0x2   :  { %v951_v1 = vld [vmem:[%s1360_s1 + $0xc0] sm:$0xff]   ;;  %867 = vmatprep.subr.bf16.mxu0 %v950_v0  ;;  %v955_v5 = vld [vmem:[%s1360_s1 + $0xc8] sm:$0xff]   ;;  %v959_v9 = vld [vmem:[%s1360_s1 + $0xd0] sm:$0xff]  }
   0x3   :  { %v952_v2 = vld [vmem:[%s1360_s1] sm:$0xff]   ;;  %907 = vmatprep.subr.bf16.mxu1 %v951_v1  ;;  %v956_v6 = vld [vmem:[%s1360_s1 + $0x8] sm:$0xff]   ;;  %v960_v10 = vld [vmem:[%s1360_s1 + $0x10] sm:$0xff]  }
   0x4   :  { %v953_v3 = vld [vmem:[%s1360_s1 + $0x80] sm:$0xff]   ;;  %868 = vmatpush3.bf16.msra.mxu0 %v952_v2  ;;  %v957_v7 = vld [vmem:[%s1360_s1 + $0x88] sm:$0xff]   ;;  %v961_v11 = vld [vmem:[%s1360_s1 + $0x90] sm:$0xff]  }
   0x5   :  { %908 = vmatpush3.bf16.msra.mxu1 %v953_v3  ;;  %869 = vmatprep.subr.bf16.mxu0 %v954_v4  ;;  %v962_v12 = vld [vmem:[%s1360_s1 + $0x58] sm:$0xff]   ;;  %v966_v16 = vld [vmem:[%s1360_s1 + $0x60] sm:$0xff]   ;;  %v970_v20 = vld [vmem:[%s1360_s1 + $0x68] sm:$0xff]  }
   0x6   :  { %909 = vmatprep.subr.bf16.mxu1 %v955_v5  ;;  %v963_v13 = vld [vmem:[%s1360_s1 + $0xd8] sm:$0xff]   ;;  %v967_v17 = vld [vmem:[%s1360_s1 + $0xe0] sm:$0xff]   ;;  %v971_v21 = vld [vmem:[%s1360_s1 + $0xe8] sm:$0xff]  }
   0x7   :  { %v964_v14 = vld [vmem:[%s1360_s1 + $0x18] sm:$0xff]   ;;  %v968_v18 = vld [vmem:[%s1360_s1 + $0x20] sm:$0xff]   ;;  %v972_v22 = vld [vmem:[%s1360_s1 + $0x28] sm:$0xff]  }
   0x8   :  { %870 = vmatpush3.bf16.msra.mxu0 %v956_v6  ;;  %v965_v15 = vld [vmem:[%s1360_s1 + $0x98] sm:$0xff]   ;;  %v969_v19 = vld [vmem:[%s1360_s1 + $0xa0] sm:$0xff]   ;;  %v973_v23 = vld [vmem:[%s1360_s1 + $0xa8] sm:$0xff]  }
   0x9   :  { %910 = vmatpush3.bf16.msra.mxu1 %v957_v7  ;;  %871 = vmatprep.subr.bf16.mxu0 %v958_v8  ;;  %v974_v24 = vld [vmem:[%s1360_s1 + $0x70] sm:$0xff]   ;;  %v978_v28 = vld [vmem:[%s1360_s1 + $0x78] sm:$0xff]  }
   0xa   :  { %911 = vmatprep.subr.bf16.mxu1 %v959_v9  ;;  %v975_v25 = vld [vmem:[%s1360_s1 + $0xf0] sm:$0xff]   ;;  %v979_v29 = vld [vmem:[%s1360_s1 + $0xf8] sm:$0xff]  }
   0xb   :  { %v976_v26 = vld [vmem:[%s1360_s1 + $0x30] sm:$0xff]   ;;  %v980_v30 = vld [vmem:[%s1360_s1 + $0x38] sm:$0xff]  }
   0xc   :  { %872 = vmatpush3.bf16.msra.mxu0 %v960_v10  ;;  %v977_v27 = vld [vmem:[%s1360_s1 + $0xb0] sm:$0xff]   ;;  %v981_v31 = vld [vmem:[%s1360_s1 + $0xb8] sm:$0xff]  }
   0xd   :  { %912 = vmatpush3.bf16.msra.mxu1 %v961_v11  ;;  %873 = vmatprep.subr.bf16.mxu0 %v962_v12  ;;  %v982_v32 = vld [vmem:[%s1361_s0] ss:$16 sps:$4 sm:$0xff]   ;;  %v984_v33 = vld [vmem:[%s1361_s0 + $0x4] ss:$16 sps:$4 sm:$0xff]   ;;  %v985_v34 = vld [vmem:[%s1361_s0 + $0x8] ss:$16 sps:$4 sm:$0xff]  }
   0xe   :  { %913 = vmatprep.subr.bf16.mxu1 %v963_v13  ;;  %v987_v35 = vld [vmem:[%s1361_s0 + $0xc] ss:$16 sps:$4 sm:$0xff]   ;;  %402 = vmatprep.mubr.bf16.mxu0 %v984_v33  ;;  %v988_v36 = vld [vmem:[%s1361_s0 + $0x24] ss:$16 sps:$4 sm:$0xff]   ;;  %v992_v38 = vld [vmem:[%s1361_s0 + $0x20] ss:$16 sps:$4 sm:$0xff]  }
   0xf   :  { %467 = vmatprep.mubr.bf16.mxu1 %v987_v35  ;;  %v990_v37 = vld [vmem:[%s1361_s0 + $0x2c] ss:$16 sps:$4 sm:$0xff]   ;;  %v993_v39 = vld [vmem:[%s1361_s0 + $0x28] ss:$16 sps:$4 sm:$0xff]   ;;  %v994_v40 = vld [vmem:[%s1361_s0 + $0x44] ss:$16 sps:$4 sm:$0xff]  }
  0x10   :  { %874 = vmatpush3.bf16.msra.mxu0 %v964_v14  ;;  %v996_v41 = vld [vmem:[%s1361_s0 + $0x4c] ss:$16 sps:$4 sm:$0xff]   ;;  %v998_v42 = vld [vmem:[%s1361_s0 + $0x40] ss:$16 sps:$4 sm:$0xff]   ;;  %v999_v43 = vld [vmem:[%s1361_s0 + $0x48] ss:$16 sps:$4 sm:$0xff]  }
  0x11   :  { %914 = vmatpush3.bf16.msra.mxu1 %v965_v15  ;;  %875 = vmatprep.subr.bf16.mxu0 %v966_v16  ;;  %v1000_v44 = vld [vmem:[%s1361_s0 + $0x64] ss:$16 sps:$4 sm:$0xff]   ;;  %v1002_v45 = vld [vmem:[%s1361_s0 + $0x6c] ss:$16 sps:$4 sm:$0xff]   ;;  %v1004_v46 = vld [vmem:[%s1361_s0 + $0x60] ss:$16 sps:$4 sm:$0xff]  }
  0x12   :  { %915 = vmatprep.subr.bf16.mxu1 %v967_v17  ;;  %v1005_v47 = vld [vmem:[%s1361_s0 + $0x68] ss:$16 sps:$4 sm:$0xff]  }
  0x14   :  { %876 = vmatpush3.bf16.msra.mxu0 %v968_v18 }
  0x15   :  { %916 = vmatpush3.bf16.msra.mxu1 %v969_v19  ;;  %877 = vmatprep.subr.bf16.mxu0 %v970_v20 }
  0x16   :  { %917 = vmatprep.subr.bf16.mxu1 %v971_v21 }
  0x18   :  { %878 = vmatpush3.bf16.msra.mxu0 %v972_v22 }
  0x19   :  { %918 = vmatpush3.bf16.msra.mxu1 %v973_v23  ;;  %879 = vmatprep.subr.bf16.mxu0 %v974_v24 }
  0x1a   :  { %919 = vmatprep.subr.bf16.mxu1 %v975_v25 }
  0x1c   :  { %880 = vmatpush3.bf16.msra.mxu0 %v976_v26 }
  0x1d   :  { %920 = vmatpush3.bf16.msra.mxu1 %v977_v27  ;;  %881 = vmatprep.subr.bf16.mxu0 %v978_v28 }
  0x1e   :  { %921 = vmatprep.subr.bf16.mxu1 %v979_v29 }
  0x20   :  { %882 = vmatpush3.bf16.msra.mxu0 %v980_v30 }
  0x21   :  { %922 = vmatpush3.bf16.msra.mxu1 %v981_v31 }
  0x23   :  { %403 = vmatmul.mubr.bf16.vlgmr.msra.gmra.mrb[0].mxu0 %v982_v32 }
  0x24   :  { %468 = vmatmul.mubr.bf16.vlgmr.msra.gmra.mrb[0].mxu1 %v985_v34  ;;  %410 = vmatprep.mubr.bf16.mxu0 %v988_v36 }
  0x25   :  { %475 = vmatprep.mubr.bf16.mxu1 %v990_v37 }
  0x2b   :  { %411 = vmatmul.mubr.bf16.gmra.mrb[4].mxu0 %v992_v38 }
  0x2c   :  { %476 = vmatmul.mubr.bf16.gmra.mrb[4].mxu1 %v993_v39  ;;  %418 = vmatprep.mubr.bf16.mxu0 %v994_v40 }
  0x2d   :  { %483 = vmatprep.mubr.bf16.mxu1 %v996_v41 }
  0x33   :  { %419 = vmatmul.mubr.bf16.gmra.mrb[8].mxu0 %v998_v42 }
  0x34   :  { %484 = vmatmul.mubr.bf16.gmra.mrb[8].mxu1 %v999_v43  ;;  %426 = vmatprep.mubr.bf16.mxu0 %v1000_v44 }
  0x35   :  { %491 = vmatprep.mubr.bf16.mxu1 %v1002_v45 }
  0x3b   :  { %427 = vmatmul.mubr.bf16.gmra.mrb[12].mxu0 %v1004_v46 }
  0x3c   :  { %492 = vmatmul.mubr.bf16.gmra.mrb[12].mxu1 %v1005_v47 }
  0xf6   :  { %v883_v48 = vpop.f32.mrb[0].mxu0 }
  0xf7   :  { %v923_v49 = vpop.f32.mrb[0].mxu1  ;;  %v884_v50 = vpop.f32.mrb[1].mxu0 }
  0xf8   :  { %v885_v51 = vadd.f32 %v884_v50, %v883_v48  ;;  %v924_v52 = vpop.f32.mrb[1].mxu1  ;;  %v886_v53 = vpop.f32.mrb[2].mxu0 }
  0xf9   :  { %v925_v54 = vadd.f32 %v924_v52, %v923_v49  ;;  %v926_v55 = vpop.f32.mrb[2].mxu1  ;;  %v887_v56 = vpop.f32.mrb[3].mxu0 }
  0xfa   :  { %v888_v57 = vadd.f32 %v887_v56, %v886_v53  ;;  %v927_v58 = vpop.f32.mrb[3].mxu1 }
  0xfb   :  { %v1192_v59 = vadd.f32 %v925_v54, %v885_v51  ;;  %v928_v60 = vadd.f32 %v927_v58, %v926_v55 }
  0xfd   :  { %v1194_v61 = vadd.f32 %v928_v60, %v888_v57  ;;  %v501_v62 = vsel %vm500_vm0, %v1192_v59, 0.0 }
  0xfe   :  { %502 = vadd.xlane.f32.xlu0 %v501_v62  ;;  %v889_v63 = vpop.f32.mrb[4].mxu0 }
  0xff   :  { %v929_v0 = vpop.f32.mrb[4].mxu1  ;;  %v890_v1 = vpop.f32.mrb[5].mxu0  ;;  %v504_v7 = vsel %vm500_vm0, %v1194_v61, 0.0 }
 0x100   :  { %v891_v2 = vadd.f32 %v890_v1, %v889_v63  ;;  %v930_v3 = vpop.f32.mrb[5].mxu1  ;;  %v892_v4 = vpop.f32.mrb[6].mxu0 }
 0x101   :  { %v931_v5 = vadd.f32 %v930_v3, %v929_v0  ;;  %v932_v6 = vpop.f32.mrb[6].mxu1  ;;  %v893_v8 = vpop.f32.mrb[7].mxu0 }
 0x102   :  { %505 = vadd.xlane.f32.xlu0 %v504_v7  ;;  %v894_v9 = vadd.f32 %v893_v8, %v892_v4  ;;  %v933_v10 = vpop.f32.mrb[7].mxu1 }
 0x103   :  { %v1200_v11 = vadd.f32 %v931_v5, %v891_v2  ;;  %v934_v12 = vadd.f32 %v933_v10, %v932_v6 }
 0x105   :  { %v1202_v13 = vadd.f32 %v934_v12, %v894_v9  ;;  %v507_v14 = vsel %vm500_vm0, %v1200_v11, 0.0 }
 0x106   :  { %508 = vadd.xlane.f32.xlu1 %v507_v14  ;;  %v895_v15 = vpop.f32.mrb[8].mxu0 }
 0x107   :  { %v935_v16 = vpop.f32.mrb[8].mxu1  ;;  %v896_v17 = vpop.f32.mrb[9].mxu0  ;;  %v510_v18 = vsel %vm500_vm0, %v1202_v13, 0.0 }
 0x108   :  { %v897_v19 = vadd.f32 %v896_v17, %v895_v15  ;;  %v936_v20 = vpop.f32.mrb[9].mxu1  ;;  %v898_v21 = vpop.f32.mrb[10].mxu0 }
 0x109   :  { %v937_v22 = vadd.f32 %v936_v20, %v935_v16  ;;  %v938_v23 = vpop.f32.mrb[10].mxu1  ;;  %v899_v24 = vpop.f32.mrb[11].mxu0 }
 0x10a   :  { %v900_v25 = vadd.f32 %v899_v24, %v898_v21  ;;  %v939_v26 = vpop.f32.mrb[11].mxu1  ;;  %511 = vadd.xlane.f32.xlu1 %v510_v18 }
 0x10b   :  { %v1208_v27 = vadd.f32 %v937_v22, %v897_v19  ;;  %v940_v28 = vadd.f32 %v939_v26, %v938_v23 }
 0x10d   :  { %v1210_v29 = vadd.f32 %v940_v28, %v900_v25  ;;  %v513_v30 = vsel %vm500_vm0, %v1208_v27, 0.0 }
 0x10e   :  { %514 = vadd.xlane.f32.xlu0 %v513_v30  ;;  %v901_v31 = vpop.f32.mrb[12].mxu0  ;;  %v1022_v30 = vmov 0  }
 0x10f   :  { %v941_v32 = vpop.f32.mrb[12].mxu1  ;;  %v902_v33 = vpop.f32.mrb[13].mxu0  ;;  %v516_v34 = vsel %vm500_vm0, %v1210_v29, 0.0  ;;  %948 = vset.pattern.permute.xlu0 %v1022_v30  ;;  %949 = vset.pattern.permute.xlu1 %v1022_v30 }
 0x110   :  { %v903_v35 = vadd.f32 %v902_v33, %v901_v31  ;;  %v942_v36 = vpop.f32.mrb[13].mxu1  ;;  %517 = vadd.xlane.f32.xlu1 %v516_v34  ;;  %v904_v37 = vpop.f32.mrb[14].mxu0 }
 0x111   :  { %v943_v38 = vadd.f32 %v942_v36, %v941_v32  ;;  %v944_v39 = vpop.f32.mrb[14].mxu1  ;;  %v905_v40 = vpop.f32.mrb[15].mxu0 }
 0x112   :  { %v906_v41 = vadd.f32 %v905_v40, %v904_v37  ;;  %v945_v42 = vpop.f32.mrb[15].mxu1 }
 0x113   :  { %v1216_v43 = vadd.f32 %v943_v38, %v903_v35  ;;  %v946_v44 = vadd.f32 %v945_v42, %v944_v39  ;;  %v582_v42 = vld [vmem:[%s1362_s2] sm:$0xff] }
 0x115   :  { %v1218_v45 = vadd.f32 %v946_v44, %v906_v41  ;;  %v519_v46 = vsel %vm500_vm0, %v1216_v43, 0.0 }
 0x116   :  { %520 = vadd.xlane.f32.xlu0 %v519_v46 }
 0x117   :  { %v522_v47 = vsel %vm500_vm0, %v1218_v45, 0.0 }
 0x118   :  { %523 = vadd.xlane.f32.xlu1 %v522_v47 }
 0x18b   :  { %v503_v48 = vpop.xlane.xlu0 %502 }
 0x18c   :  { %v1224_v49 = vmul.f32 0.03125, %v503_v48 }
 0x18e   :  { %v534_v50 = vsub.f32 %v1192_v59, %v1224_v49 }
 0x18f   :  { %v506_v51 = vpop.xlane.xlu0 %505 }
 0x190   :  { %v1228_v52 = vmul.f32 0.03125, %v506_v51  ;;  %v542_v53 = vmul.f32 %v534_v50, %v534_v50  ;;  %v583_v50 = vld [vmem:[%s1362_s2 + $0x8] sm:$0xff] }
 0x192   :  { %v535_v54 = vsub.f32 %v1194_v61, %v1228_v52  ;;  %v550_v55 = vsel %vm500_vm0, %v542_v53, 0.0 }
 0x193   :  { %v509_v56 = vpop.xlane.xlu1 %508  ;;  %551 = vadd.xlane.f32.xlu0 %v550_v55 }
 0x194   :  { %v1233_v57 = vmul.f32 0.03125, %v509_v56  ;;  %v543_v58 = vmul.f32 %v535_v54, %v535_v54 }
 0x196   :  { %v536_v60 = vsub.f32 %v1200_v11, %v1233_v57  ;;  %v553_v62 = vsel %vm500_vm0, %v543_v58, 0.0 }
 0x197   :  { %v512_v63 = vpop.xlane.xlu1 %511  ;;  %554 = vadd.xlane.f32.xlu1 %v553_v62  ;;  %v615_v62 = vld [vmem:[%s1363_s3 + $0x8] sm:$0xff] }
 0x198   :  { %v1238_v0 = vmul.f32 0.03125, %v512_v63  ;;  %v544_v1 = vmul.f32 %v536_v60, %v536_v60  ;;  %v614_v63 = vld [vmem:[%s1363_s3] sm:$0xff] }
 0x19a   :  { %v537_v2 = vsub.f32 %v1202_v13, %v1238_v0  ;;  %v556_v3 = vsel %vm500_vm0, %v544_v1, 0.0 }
 0x19b   :  { %557 = vadd.xlane.f32.xlu0 %v556_v3  ;;  %v515_v4 = vpop.xlane.xlu0 %514 }
 0x19c   :  { %v1243_v5 = vmul.f32 0.03125, %v515_v4  ;;  %v545_v6 = vmul.f32 %v537_v2, %v537_v2 }
 0x19d   :  { %v518_v7 = vpop.xlane.xlu1 %517 }
 0x19e   :  { %v538_v8 = vsub.f32 %v1208_v27, %v1243_v5  ;;  %v1247_v9 = vmul.f32 0.03125, %v518_v7  ;;  %v559_v10 = vsel %vm500_vm0, %v545_v6, 0.0  ;;  %v585_v7 = vld [vmem:[%s1362_s2 + $0x18] sm:$0xff] }
 0x19f   :  { %560 = vadd.xlane.f32.xlu1 %v559_v10 }
 0x1a0   :  { %v539_v12 = vsub.f32 %v1210_v29, %v1247_v9  ;;  %v546_v14 = vmul.f32 %v538_v8, %v538_v8 }
 0x1a2   :  { %v562_v15 = vsel %vm500_vm0, %v546_v14, 0.0  ;;  %v547_v16 = vmul.f32 %v539_v12, %v539_v12 }
 0x1a3   :  { %563 = vadd.xlane.f32.xlu0 %v562_v15  ;;  %v521_v17 = vpop.xlane.xlu0 %520 }
 0x1a4   :  { %v1253_v18 = vmul.f32 0.03125, %v521_v17  ;;  %v565_v19 = vsel %vm500_vm0, %v547_v16, 0.0  ;;  %v617_v17 = vld [vmem:[%s1363_s3 + $0x18] sm:$0xff] }
 0x1a5   :  { %v524_v20 = vpop.xlane.xlu1 %523  ;;  %566 = vadd.xlane.f32.xlu1 %v565_v19 }
 0x1a6   :  { %v540_v21 = vsub.f32 %v1216_v43, %v1253_v18  ;;  %v1258_v22 = vmul.f32 0.03125, %v524_v20 }
 0x1a8   :  { %v541_v23 = vsub.f32 %v1218_v45, %v1258_v22  ;;  %v548_v24 = vmul.f32 %v540_v21, %v540_v21  ;;  %v587_v21 = vld [vmem:[%s1362_s2 + $0x28] sm:$0xff] }
 0x1aa   :  { %v568_v25 = vsel %vm500_vm0, %v548_v24, 0.0  ;;  %v549_v26 = vmul.f32 %v541_v23, %v541_v23 }
 0x1ab   :  { %569 = vadd.xlane.f32.xlu0 %v568_v25 }
 0x1ac   :  { %v571_v28 = vsel %vm500_vm0, %v549_v26, 0.0  ;;  %v616_v26 = vld [vmem:[%s1363_s3 + $0x10] sm:$0xff] }
 0x1ad   :  { %572 = vadd.xlane.f32.xlu1 %v571_v28 }
 0x220   :  { %v552_v31 = vpop.xlane.xlu0 %551 }
 0x221   :  { %v574_v32 = vmul.f32 0.03125, %v552_v31 }
 0x223   :  { %v590_v33 = vadd.f32 1e-05, %v574_v32 }
 0x224   :  { %v555_v34 = vpop.xlane.xlu1 %554 }
 0x225   :  { %1006 = vrsqrt.f32 %v590_v33  ;;  %v575_v35 = vmul.f32 0.03125, %v555_v34 }
 0x227   :  { %v591_v36 = vadd.f32 1e-05, %v575_v35  ;;  %v589_v35 = vld [vmem:[%s1362_s2 + $0x38] sm:$0xff] }
 0x228   :  { %v558_v37 = vpop.xlane.xlu0 %557 }
 0x229   :  { %1008 = vrsqrt.f32 %v591_v36  ;;  %v576_v38 = vmul.f32 0.03125, %v558_v37 }
 0x22b   :  { %v592_v39 = vadd.f32 1e-05, %v576_v38 }
 0x22c   :  { %v561_v40 = vpop.xlane.xlu1 %560 }
 0x22d   :  { %v577_v41 = vmul.f32 0.03125, %v561_v40  ;;  %1010 = vrsqrt.f32 %v592_v39 }
 0x22f   :  { %v1007_v44 = vpop.eup %1006  ;;  %v593_v46 = vadd.f32 1e-05, %v577_v41  ;;  %v618_v41 = vld [vmem:[%s1363_s3 + $0x20] sm:$0xff] }
 0x230   :  { %v564_v47 = vpop.xlane.xlu0 %563  ;;  %v606_v48 = vmul.f32 %v1007_v44, %v582_v42 }
 0x231   :  { %1012 = vrsqrt.f32 %v593_v46  ;;  %v578_v54 = vmul.f32 0.03125, %v564_v47  ;;  %v588_v47 = vld [vmem:[%s1362_s2 + $0x30] sm:$0xff] }
 0x232   :  { %v567_v51 = vpop.xlane.xlu1 %566  ;;  %640 = vperm.xlu0 %948, %v606_v48   ;;  %v622_v58 = vmul.f32 %v606_v48, %v1224_v49  ;;  %v584_v49 = vld [vmem:[%s1362_s2 + $0x10] sm:$0xff] }
 0x233   :  { %v1009_v53 = vpop.eup %1008  ;;  %v579_v55 = vmul.f32 0.03125, %v567_v51  ;;  %v594_v2 = vadd.f32 1e-05, %v578_v54 }
 0x234   :  { %v607_v56 = vmul.f32 %v1009_v53, %v583_v50  ;;  %v630_v4 = vsub.f32 %v614_v63, %v622_v58 }
 0x235   :  { %v595_v60 = vadd.f32 1e-05, %v579_v55 }
 0x236   :  { %645 = vperm.xlu1 %949, %v607_v56   ;;  %v623_v1 = vmul.f32 %v607_v56, %v1228_v52 }
 0x237   :  { %1014 = vrsqrt.f32 %v595_v60  ;;  %v1011_v6 = vpop.eup %1010 }
 0x238   :  { %v631_v3 = vsub.f32 %v615_v62, %v623_v1  ;;  %1016 = vrsqrt.f32 %v594_v2  ;;  %v570_v52 = vpop.xlane.xlu0 %569  ;;  %v608_v14 = vmul.f32 %v1011_v6, %v584_v49 }
 0x239   :  { %v580_v20 = vmul.f32 0.03125, %v570_v52 }
 0x23a   :  { %v573_v8 = vpop.xlane.xlu1 %572  ;;  %693 = vperm.xlu0 %948, %v631_v3   ;;  %688 = vperm.xlu1 %949, %v630_v4   ;;  %v624_v24 = vmul.f32 %v608_v14, %v1233_v57  ;;  %v586_v57 = vld [vmem:[%s1362_s2 + $0x20] sm:$0xff] }
 0x23b   :  { %v1013_v10 = vpop.eup %1012  ;;  %v581_v12 = vmul.f32 0.03125, %v573_v8  ;;  %v596_v30 = vadd.f32 1e-05, %v580_v20 }
 0x23c   :  { %v609_v15 = vmul.f32 %v1013_v10, %v585_v7  ;;  %v632_v31 = vsub.f32 %v616_v26, %v624_v24 }
 0x23d   :  { %v597_v16 = vadd.f32 1e-05, %v581_v12 }
 0x23e   :  { %650 = vperm.xlu1 %949, %v608_v14   ;;  %v625_v19 = vmul.f32 %v609_v15, %v1238_v0  ;;  %v619_v0 = vld [vmem:[%s1363_s3 + $0x28] sm:$0xff] }
 0x23f   :  { %1018 = vrsqrt.f32 %v597_v16 }
 0x240   :  { %v633_v23 = vsub.f32 %v617_v17, %v625_v19  ;;  %1020 = vrsqrt.f32 %v596_v30 }
 0x241   :  { %v1015_v25 = vpop.eup %1014 }
 0x242   :  { %703 = vperm.xlu0 %948, %v633_v23   ;;  %655 = vperm.xlu1 %949, %v609_v15   ;;  %v611_v28 = vmul.f32 %v1015_v25, %v587_v21  ;;  %v1017_v33 = vpop.eup %1016 }
 0x243   :  { %v610_v36 = vmul.f32 %v1017_v33, %v586_v57 }
 0x244   :  { %v627_v32 = vmul.f32 %v611_v28, %v1247_v9  ;;  %v621_v9 = vld [vmem:[%s1363_s3 + $0x38] sm:$0xff] }
 0x245   :  { %v626_v40 = vmul.f32 %v610_v36, %v1243_v5  ;;  %v620_v5 = vld [vmem:[%s1363_s3 + $0x30] sm:$0xff] }
 0x246   :  { %698 = vperm.xlu1 %949, %v632_v31   ;;  %v635_v34 = vsub.f32 %v619_v0, %v627_v32 }
 0x247   :  { %v634_v44 = vsub.f32 %v618_v41, %v626_v40 }
 0x248   :  { %713 = vperm.xlu0 %948, %v635_v34  }
 0x249   :  { %v1019_v37 = vpop.eup %1018 }
 0x24a   :  { %660 = vperm.xlu1 %949, %v610_v36   ;;  %v613_v38 = vmul.f32 %v1019_v37, %v589_v35  ;;  %v1021_v46 = vpop.eup %1020 }
 0x24b   :  { %v612_v48 = vmul.f32 %v1021_v46, %v588_v47 }
 0x24c   :  { %v629_v39 = vmul.f32 %v613_v38, %v1258_v22 }
 0x24d   :  { %v628_v22 = vmul.f32 %v612_v48, %v1253_v18 }
 0x24e   :  { %665 = vperm.xlu1 %949, %v611_v28   ;;  %v637_v42 = vsub.f32 %v621_v9, %v629_v39 }
 0x24f   :  { %v636_v50 = vsub.f32 %v620_v5, %v628_v22 }
 0x250   :  { %723 = vperm.xlu0 %948, %v637_v42  }
 0x252   :  { %708 = vperm.xlu1 %949, %v634_v44  }
 0x256   :  { %670 = vperm.xlu1 %949, %v612_v48  }
 0x25a   :  { %675 = vperm.xlu1 %949, %v613_v38  }
 0x25e   :  { %718 = vperm.xlu1 %949, %v636_v50  }
 0x2b1   :  { %v641_v51 = vpop.permute.xlu0 %640 }
 0x2b2   :  { %v678_v54 = vmul.f32 %v641_v51, %v1192_v59 }
 0x2b5   :  { %v646_v53 = vpop.permute.xlu1 %645 }
 0x2b6   :  { %v679_v55 = vmul.f32 %v646_v53, %v1194_v61 }
 0x2b9   :  { %v689_v56 = vpop.permute.xlu1 %688  ;;  %v694_v58 = vpop.permute.xlu0 %693 }
 0x2ba   :  { %v726_v60 = vadd.f32 %v689_v56, %v678_v54  ;;  %v727_v62 = vadd.f32 %v694_v58, %v679_v55 }
 0x2bc   :  { %vm734_vm1 = vcmp.gt.f32.partialorder %v726_v60, 0.0  ;;  %v742_v63 = vmul.f32 0.2, %v726_v60  ;;  %vm735_vm2 = vcmp.gt.f32.partialorder %v727_v62, 0.0  ;;  %v743_v18 = vmul.f32 0.2, %v727_v62 }
 0x2bd   :  { %v651_v1 = vpop.permute.xlu1 %650 }
 0x2be   :  { %v750_v2 = vsel %vm734_vm1, %v726_v60, %v742_v63  ;;  %v751_v3 = vsel %vm735_vm2, %v727_v62, %v743_v18  ;;  %v680_v7 = vmul.f32 %v651_v1, %v1200_v11 }
 0x2bf   :  { %v859_v4 = vpack.c.bf16 %v750_v2, %v750_v2  ;;  %v860_v6 = vpack.c.bf16 %v751_v3, %v751_v3 }
 0x2c1   :  { %791 = vst.msk [vmem:[%s1364_s4] sm:$0xf] %vm790_vm3, %v859_v4  ;;  %792 = vst.msk [vmem:[%s1364_s4 + $0x4] sm:$0xf] %vm790_vm3, %v860_v6  ;;  %v656_v59 = vpop.permute.xlu1 %655  ;;  %v704_v49 = vpop.permute.xlu0 %703 }
 0x2c2   :  { %v681_v61 = vmul.f32 %v656_v59, %v1202_v13 }
 0x2c4   :  { %v729_v8 = vadd.f32 %v704_v49, %v681_v61 }
 0x2c5   :  { %v699_v10 = vpop.permute.xlu1 %698 }
 0x2c6   :  { %vm737_vm4 = vcmp.gt.f32.partialorder %v729_v8, 0.0  ;;  %v745_v12 = vmul.f32 0.2, %v729_v8  ;;  %v728_v52 = vadd.f32 %v699_v10, %v680_v7 }
 0x2c7   :  { %v714_v21 = vpop.permute.xlu0 %713 }
 0x2c8   :  { %v753_v14 = vsel %vm737_vm4, %v729_v8, %v745_v12  ;;  %vm736_vm5 = vcmp.gt.f32.partialorder %v728_v52, 0.0  ;;  %v744_v15 = vmul.f32 0.2, %v728_v52 }
 0x2c9   :  { %v862_v16 = vpack.c.bf16 %v753_v14, %v753_v14  ;;  %v661_v17 = vpop.permute.xlu1 %660 }
 0x2ca   :  { %v752_v19 = vsel %vm736_vm5, %v728_v52, %v744_v15  ;;  %v682_v23 = vmul.f32 %v661_v17, %v1208_v27 }
 0x2cb   :  { %794 = vst.msk [vmem:[%s1364_s4 + $0xc] sm:$0xf] %vm790_vm3, %v862_v16  ;;  %v861_v13 = vpack.c.bf16 %v752_v19, %v752_v19 }
 0x2cd   :  { %793 = vst.msk [vmem:[%s1364_s4 + $0x8] sm:$0xf] %vm790_vm3, %v861_v13  ;;  %v666_v11 = vpop.permute.xlu1 %665 }
 0x2ce   :  { %v683_v20 = vmul.f32 %v666_v11, %v1210_v29 }
 0x2cf   :  { %v724_v34 = vpop.permute.xlu0 %723 }
 0x2d0   :  { %v731_v24 = vadd.f32 %v714_v21, %v683_v20 }
 0x2d1   :  { %v709_v25 = vpop.permute.xlu1 %708 }
 0x2d2   :  { %vm739_vm6 = vcmp.gt.f32.partialorder %v731_v24, 0.0  ;;  %v747_v26 = vmul.f32 0.2, %v731_v24  ;;  %v730_v28 = vadd.f32 %v709_v25, %v682_v23 }
 0x2d4   :  { %v755_v30 = vsel %vm739_vm6, %v731_v24, %v747_v26  ;;  %vm738_vm7 = vcmp.gt.f32.partialorder %v730_v28, 0.0  ;;  %v746_v0 = vmul.f32 0.2, %v730_v28 }
 0x2d5   :  { %v864_v31 = vpack.c.bf16 %v755_v30, %v755_v30  ;;  %v671_v32 = vpop.permute.xlu1 %670 }
 0x2d6   :  { %v754_v33 = vsel %vm738_vm7, %v730_v28, %v746_v0  ;;  %v684_v35 = vmul.f32 %v671_v32, %v1216_v43 }
 0x2d7   :  { %796 = vst.msk [vmem:[%s1364_s4 + $0x14] sm:$0xf] %vm790_vm3, %v864_v31  ;;  %v863_v29 = vpack.c.bf16 %v754_v33, %v754_v33 }
 0x2d9   :  { %795 = vst.msk [vmem:[%s1364_s4 + $0x10] sm:$0xf] %vm790_vm3, %v863_v29  ;;  %v676_v27 = vpop.permute.xlu1 %675 }
 0x2da   :  { %v685_v57 = vmul.f32 %v676_v27, %v1218_v45 }
 0x2dc   :  { %v733_v36 = vadd.f32 %v724_v34, %v685_v57 }
 0x2dd   :  { %v719_v37 = vpop.permute.xlu1 %718 }
 0x2de   :  { %vm741_vm8 = vcmp.gt.f32.partialorder %v733_v36, 0.0  ;;  %v749_v38 = vmul.f32 0.2, %v733_v36  ;;  %v732_v9 = vadd.f32 %v719_v37, %v684_v35 }
 0x2e0   :  { %v757_v39 = vsel %vm741_vm8, %v733_v36, %v749_v38  ;;  %vm740_vm9 = vcmp.gt.f32.partialorder %v732_v9, 0.0  ;;  %v748_v40 = vmul.f32 0.2, %v732_v9 }
 0x2e1   :  { %v866_v41 = vpack.c.bf16 %v757_v39, %v757_v39 }
 0x2e2   :  { %v756_v42 = vsel %vm740_vm9, %v732_v9, %v748_v40 }
 0x2e3   :  { %798 = vst.msk [vmem:[%s1364_s4 + $0x1c] sm:$0xf] %vm790_vm3, %v866_v41  ;;  %v865_v44 = vpack.c.bf16 %v756_v42, %v756_v42 }
 0x2e5   :  { %797 = vst.msk [vmem:[%s1364_s4 + $0x18] sm:$0xf] %vm790_vm3, %v865_v44 }

</bundles_post_ra>
